<compile_context>
chip_gen: v7x
topology: tpu7x:2x2x1
jax: 0.10.0
libtpu: 0.0.40
codegen_flags: <defaults>
</compile_context>

<pallas_src>
import numpy as np
import jax
import jax.numpy as jnp
from jax import lax
from jax.experimental import pallas as pl
from jax.experimental.pallas import tpu as pltpu

# ----------------------------- configuration --------------------------------
B = 2                      # batch
IMG_SHAPE = (3, 5, 5)      # (C, H, W) as in the module default
CHANNELS = [16, 32, 64]
KSIZE = 3
EMBED = 32                 # embedding_size (divisible by group_size)
GROUP = 8                  # SimNorm group size
NGROUP = EMBED // GROUP
C_IN, H, W = IMG_SHAPE
P = H * W                  # spatial positions per image
BP = B * P                 # real flattened rows (50)
BP_PAD = 64                # rows padded to a multiple of 8 sublanes
BN_EPS = 1e-5

# 3x3 taps in (kh, kw) row-major order, expressed as (dh, dw) offsets.
_TAPS = [(kh - 1, kw - 1) for kh in range(KSIZE) for kw in range(KSIZE)]
_CONV_DIMS = list(zip([C_IN] + CHANNELS[:-1], CHANNELS))

# Advisory cost estimate (helps XLA schedule/overlap the custom call).
_FLOPS = (2 * BP_PAD * sum((9 * cin + 1) * cout for cin, cout in _CONV_DIMS)
          + 2 * B * BP_PAD * CHANNELS[-1]            # pooling selector matmul
          + 2 * B * CHANNELS[-1] * EMBED             # linear
          + 2 * B * EMBED * EMBED)                   # SimNorm group-sum matmul
_TRANSCENDENTALS = BP_PAD * sum(CHANNELS) + B * EMBED
_BYTES = 4 * (BP_PAD * C_IN
              + sum(BP_PAD * (9 * cin + 1) + (9 * cin + 1) * cout
                    for cin, cout in _CONV_DIMS)
              + B * BP_PAD + CHANNELS[-1] * EMBED + EMBED * EMBED + B * EMBED)


def _gelu_tanh(v):
    # GELU with tanh approximation (matches nn.GELU(approximate='tanh')).
    c = 0.7978845608028654  # sqrt(2/pi)
    return 0.5 * v * (1.0 + jnp.tanh(c * (v + 0.044715 * v * v * v)))


# ------------------------------- the kernel ---------------------------------
def encoder_kernel(x_ref, m1_ref, w1_ref, m2_ref, w2_ref, m3_ref, w3_ref,
                   sel_ref, wlin_ref, gg_ref, out_ref):

    def conv_bn_act(h, m_ref, w_ref):
        # im2col: 8 XLU row rotations (+ the unshifted center tap) concatenated on the
        # lane axis, a ones column carrying the folded BatchNorm bias, one full-width
        # mask multiply (image boundaries + row padding), one deep-K MXU matmul.
        cols = []
        for dh, dw in _TAPS:
            delta = dh * W + dw
            if delta == 0:
                cols.append(h)                                  # center tap
            else:
                # out[r] = h[r + delta]; rows that receive wrapped data are exactly the
                # rows the precomputed mask zeroes, so roll is exact here.
                cols.append(pltpu.roll(h, shift=(-delta) % BP_PAD, axis=0))
        cols.append(jnp.ones((BP_PAD, 1), jnp.float32))         # bias column
        patch = jnp.concatenate(cols, axis=1) * m_ref[...]      # (BP_PAD, 9*Cin + 1)
        acc = jnp.dot(patch, w_ref[...],
                      preferred_element_type=jnp.float32)       # (BP_PAD, Cout)
        return _gelu_tanh(acc)

    h = x_ref[...]                                              # (BP_PAD, C_IN)
    h = conv_bn_act(h, m1_ref, w1_ref)                          # (BP_PAD, 16)
    h = conv_bn_act(h, m2_ref, w2_ref)                          # (BP_PAD, 32)
    h = conv_bn_act(h, m3_ref, w3_ref)                          # (BP_PAD, 64)

    # AdaptiveAvgPool2d(1): one selector matmul on the idle MXU; the 1/P factor is
    # folded into the linear weight on the host.  Pad rows have selector weight 0.
    hsum = jnp.dot(sel_ref[...], h,
                   preferred_element_type=jnp.float32)          # (B, 64)
    y = jnp.dot(hsum, wlin_ref[...],
                preferred_element_type=jnp.float32)             # (B, EMBED)

    # SimNorm: softmax within groups of GROUP.  A single whole-row max is used for
    # numerical safety (softmax is shift-invariant within each group); group sums are
    # one block-ones matmul; exact divide keeps group sums == 1 to f32 precision.
    e = jnp.exp(y - jnp.max(y, axis=-1, keepdims=True))
    denom = jnp.dot(e, gg_ref[...],
                    preferred_element_type=jnp.float32)         # (B, EMBED)
    out_ref[...] = e / denom


# ------------------------------ host wrapper ---------------------------------
def prepare_kernel_params(params):
    """One-time host-side fold: BN scale into conv weights, BN bias into an extra
    weight row, 1/P into the linear weight, and all index math (tap boundary masks,
    pooling selector, SimNorm group matrix) into small resident f32 operands.
    No per-call host work remains."""
    (w1, s1, b1, w2, s2, b2, w3, s3, b3, wlin) = params

    # Per-tap validity masks over the padded row space, built once with numpy.
    r = np.arange(BP_PAD)
    p = r % P
    ii = p // W
    jj = p % W
    valid_row = (r < BP).astype(np.float32)
    tap_masks = []
    for dh, dw in _TAPS:
        ok = ((ii + dh >= 0) & (ii + dh < H) & (jj + dw >= 0) & (jj + dw < W))
        tap_masks.append(ok.astype(np.float32) * valid_row)     # (BP_PAD,)

    def fold(w_k, s, b):
        # w_k: (9, Cin, Cout) tap-major; s, b: (1, Cout).
        kk, cin, cout = w_k.shape
        wf = (w_k * s.reshape(1, 1, cout)).reshape(kk * cin, cout)
        wf = jnp.concatenate([wf, b.reshape(1, cout)], axis=0)  # bias row (ones column)
        mk = np.concatenate(
            [np.repeat(m[:, None], cin, axis=1) for m in tap_masks]
            + [np.ones((BP_PAD, 1), np.float32)], axis=1)       # (BP_PAD, 9*Cin + 1)
        return jnp.asarray(mk), wf

    m1, w1f = fold(w1, s1, b1)
    m2, w2f = fold(w2, s2, b2)
    m3, w3f = fold(w3, s3, b3)

    # Pooling selector: sel[b, r] = 1 for rows of image b, 0 for other images / padding.
    sel = np.zeros((B, BP_PAD), np.float32)
    for bi in range(B):
        sel[bi, bi * P:(bi + 1) * P] = 1.0

    # SimNorm block-ones matrix: gg[j, k] = 1 iff j and k are in the same group.
    gg = np.kron(np.eye(NGROUP, dtype=np.float32),
                 np.ones((GROUP, GROUP), np.float32))

    wlinf = wlin / float(P)                                     # fold avg-pool 1/P
    return (m1, w1f, m2, w2f, m3, w3f, jnp.asarray(sel), wlinf, jnp.asarray(gg))


@jax.jit
def latent_encoder_pallas(image_nchw, kparams):
    (m1, w1f, m2, w2f, m3, w3f, sel, wlinf, gg) = kparams
    # NCHW -> (B*H*W, C_in) channels-last, padded to BP_PAD rows (one tiny fused op).
    x = jnp.transpose(image_nchw.astype(jnp.float32), (0, 2, 3, 1)).reshape(BP, C_IN)
    x = jnp.pad(x, ((0, BP_PAD - BP), (0, 0)))

    vmem = pl.BlockSpec(memory_space=pltpu.MemorySpace.VMEM)
    operands = (x, m1, w1f, m2, w2f, m3, w3f, sel, wlinf, gg)
    return pl.pallas_call(
        encoder_kernel,
        out_shape=jax.ShapeDtypeStruct((B, EMBED), jnp.float32),
        in_specs=[vmem] * len(operands),
        out_specs=vmem,
        cost_estimate=pl.CostEstimate(flops=_FLOPS,
                                      transcendentals=_TRANSCENDENTALS,
                                      bytes_accessed=_BYTES),
    )(*operands)


# --------------------------- deterministic params ----------------------------
def make_params(key):
    chans = [C_IN] + CHANNELS
    keys = jax.random.split(key, 16)
    ki = iter(range(16))
    params = []
    for li in range(3):
        cin, cout = chans[li], chans[li + 1]
        # Conv weight in HWIO, then flattened to (9, cin, cout) for the kernel.
        w_hwio = 0.1 * jax.random.normal(keys[next(ki)], (KSIZE, KSIZE, cin, cout),
                                         jnp.float32)
        w_k = w_hwio.reshape(KSIZE * KSIZE, cin, cout)
        # BatchNorm (inference mode) folded to scale/bias.
        gamma = 1.0 + 0.1 * jax.random.normal(keys[next(ki)], (cout,), jnp.float32)
        beta = 0.1 * jax.random.normal(keys[next(ki)], (cout,), jnp.float32)
        rmean = 0.05 * jax.random.normal(keys[next(ki)], (cout,), jnp.float32)
        rvar = jnp.abs(0.2 * jax.random.normal(keys[next(ki)], (cout,), jnp.float32)) + 0.8
        scale = gamma / jnp.sqrt(rvar + BN_EPS)
        bias = beta - rmean * scale
        params += [w_k, scale.reshape(1, cout), bias.reshape(1, cout)]
    # Linear(64 -> EMBED, bias=False), kaiming_normal fan_out / relu: std = sqrt(2/EMBED).
    wlin = jax.random.normal(keys[next(ki)], (CHANNELS[-1], EMBED), jnp.float32) \
        * np.sqrt(2.0 / EMBED)
    params.append(wlin)
    return tuple(params)


# ------------------------------ pure-JAX reference ---------------------------
def reference(image_nchw, params):
    (w1, s1, b1, w2, s2, b2, w3, s3, b3, wlin) = params
    x = jnp.transpose(image_nchw.astype(jnp.float32), (0, 2, 3, 1))   # NHWC
    for w_k, s, b in ((w1, s1, b1), (w2, s2, b2), (w3, s3, b3)):
        w_hwio = w_k.reshape(KSIZE, KSIZE, w_k.shape[1], w_k.shape[2])
        x = lax.conv_general_dilated(x, w_hwio, (1, 1), 'SAME',
                                     dimension_numbers=('NHWC', 'HWIO', 'NHWC'))
        x = x * s + b
        x = _gelu_tanh(x)
    x = x.mean(axis=(1, 2))                                           # adaptive avg pool
    y = x @ wlin
    yg = y.reshape(B, EMBED // GROUP, GROUP)
    yg = jax.nn.softmax(yg, axis=-1)
    return yg.reshape(B, EMBED)


# ----------------------------------- main ------------------------------------
if __name__ == "__main__":
    key = jax.random.PRNGKey(0)
    k_img, k_par = jax.random.split(key)
    image = jax.random.normal(k_img, (B, C_IN, H, W), jnp.float32)    # NCHW, like PyTorch
    params = make_params(k_par)
    kparams = prepare_kernel_params(params)   # folded once; stays resident on device

    out = jax.block_until_ready(latent_encoder_pallas(image, kparams))
    ref = jax.block_until_ready(reference(image, params))

    assert out.shape == (B, EMBED)
    np.testing.assert_allclose(np.asarray(out), np.asarray(ref), rtol=2e-3, atol=2e-3)
    # Each SimNorm group sums to 1.
    np.testing.assert_allclose(
        np.asarray(out).reshape(B, EMBED // GROUP, GROUP).sum(-1), 1.0, atol=1e-5)

    print("KERNEL_OK")
</pallas_src>

<mosaic_0001>
module attributes {stable_mosaic.version = 11 : i64} {
  func.func @encoder_kernel(%arg0: memref<64x3xf32, #tpu.memory_space<vmem>>, %arg1: memref<64x28xf32, #tpu.memory_space<vmem>>, %arg2: memref<28x16xf32, #tpu.memory_space<vmem>>, %arg3: memref<64x145xf32, #tpu.memory_space<vmem>>, %arg4: memref<145x32xf32, #tpu.memory_space<vmem>>, %arg5: memref<64x289xf32, #tpu.memory_space<vmem>>, %arg6: memref<289x64xf32, #tpu.memory_space<vmem>>, %arg7: memref<2x64xf32, #tpu.memory_space<vmem>>, %arg8: memref<64x32xf32, #tpu.memory_space<vmem>>, %arg9: memref<32x32xf32, #tpu.memory_space<vmem>>, %arg10: memref<2x32xf32, #tpu.memory_space<vmem>>) attributes {dimension_semantics = [], scalar_prefetch = 0 : i64, scratch_operands = 0 : i64, tpu.core_type = #tpu.core_type<tc>} {
    %c0 = arith.constant 0 : index
    %c0_0 = arith.constant 0 : index
    %0 = vector.load %arg0[%c0, %c0_0] : memref<64x3xf32, #tpu.memory_space<vmem>>, vector<64x3xf32>
    %c6_i32 = arith.constant 6 : i32
    %1 = tpu.dynamic_rotate %0 by %c6_i32 dim 0 : vector<64x3xf32>, i32 -> vector<64x3xf32>
    %c5_i32 = arith.constant 5 : i32
    %2 = tpu.dynamic_rotate %0 by %c5_i32 dim 0 : vector<64x3xf32>, i32 -> vector<64x3xf32>
    %c4_i32 = arith.constant 4 : i32
    %3 = tpu.dynamic_rotate %0 by %c4_i32 dim 0 : vector<64x3xf32>, i32 -> vector<64x3xf32>
    %c1_i32 = arith.constant 1 : i32
    %4 = tpu.dynamic_rotate %0 by %c1_i32 dim 0 : vector<64x3xf32>, i32 -> vector<64x3xf32>
    %c63_i32 = arith.constant 63 : i32
    %5 = tpu.dynamic_rotate %0 by %c63_i32 dim 0 : vector<64x3xf32>, i32 -> vector<64x3xf32>
    %c60_i32 = arith.constant 60 : i32
    %6 = tpu.dynamic_rotate %0 by %c60_i32 dim 0 : vector<64x3xf32>, i32 -> vector<64x3xf32>
    %c59_i32 = arith.constant 59 : i32
    %7 = tpu.dynamic_rotate %0 by %c59_i32 dim 0 : vector<64x3xf32>, i32 -> vector<64x3xf32>
    %c58_i32 = arith.constant 58 : i32
    %8 = tpu.dynamic_rotate %0 by %c58_i32 dim 0 : vector<64x3xf32>, i32 -> vector<64x3xf32>
    %cst = arith.constant 1.000000e+00 : f32
    %9 = vector.broadcast %cst : f32 to vector<64x1xf32>
    %10 = tpu.concatenate %1, %2, %3, %4, %0, %5, %6, %7, %8, %9 in 1 : vector<64x3xf32>, vector<64x3xf32>, vector<64x3xf32>, vector<64x3xf32>, vector<64x3xf32>, vector<64x3xf32>, vector<64x3xf32>, vector<64x3xf32>, vector<64x3xf32>, vector<64x1xf32> -> vector<64x28xf32>
    %c0_1 = arith.constant 0 : index
    %c0_2 = arith.constant 0 : index
    %11 = vector.load %arg1[%c0_1, %c0_2] : memref<64x28xf32, #tpu.memory_space<vmem>>, vector<64x28xf32>
    %12 = arith.mulf %10, %11 : vector<64x28xf32>
    %c0_3 = arith.constant 0 : index
    %c0_4 = arith.constant 0 : index
    %13 = vector.load %arg2[%c0_3, %c0_4] : memref<28x16xf32, #tpu.memory_space<vmem>>, vector<28x16xf32>
    %cst_5 = arith.constant dense<0.000000e+00> : vector<64x16xf32>
    %14 = tpu.matmul %12, %13, %cst_5 {dimension_numbers = #tpu.dot_dimension_numbers<[1], [0], [0], [1], [0, 0, 1, 1], [], []>} : vector<64x28xf32>, vector<28x16xf32>, vector<64x16xf32> -> vector<64x16xf32>
    %cst_6 = arith.constant 5.000000e-01 : f32
    %15 = vector.broadcast %cst_6 : f32 to vector<64x16xf32>
    %16 = arith.mulf %15, %14 : vector<64x16xf32>
    %cst_7 = arith.constant 4.471500e-02 : f32
    %17 = vector.broadcast %cst_7 : f32 to vector<64x16xf32>
    %18 = arith.mulf %17, %14 : vector<64x16xf32>
    %19 = arith.mulf %18, %14 : vector<64x16xf32>
    %20 = arith.mulf %19, %14 : vector<64x16xf32>
    %21 = arith.addf %14, %20 : vector<64x16xf32>
    %cst_8 = arith.constant 0.797884583 : f32
    %22 = vector.broadcast %cst_8 : f32 to vector<64x16xf32>
    %23 = arith.mulf %22, %21 : vector<64x16xf32>
    %24 = math.tanh %23 : vector<64x16xf32>
    %cst_9 = arith.constant 1.000000e+00 : f32
    %25 = vector.broadcast %cst_9 : f32 to vector<64x16xf32>
    %26 = arith.addf %25, %24 : vector<64x16xf32>
    %27 = arith.mulf %16, %26 : vector<64x16xf32>
    %c6_i32_10 = arith.constant 6 : i32
    %28 = tpu.dynamic_rotate %27 by %c6_i32_10 dim 0 : vector<64x16xf32>, i32 -> vector<64x16xf32>
    %c5_i32_11 = arith.constant 5 : i32
    %29 = tpu.dynamic_rotate %27 by %c5_i32_11 dim 0 : vector<64x16xf32>, i32 -> vector<64x16xf32>
    %c4_i32_12 = arith.constant 4 : i32
    %30 = tpu.dynamic_rotate %27 by %c4_i32_12 dim 0 : vector<64x16xf32>, i32 -> vector<64x16xf32>
    %c1_i32_13 = arith.constant 1 : i32
    %31 = tpu.dynamic_rotate %27 by %c1_i32_13 dim 0 : vector<64x16xf32>, i32 -> vector<64x16xf32>
    %c63_i32_14 = arith.constant 63 : i32
    %32 = tpu.dynamic_rotate %27 by %c63_i32_14 dim 0 : vector<64x16xf32>, i32 -> vector<64x16xf32>
    %c60_i32_15 = arith.constant 60 : i32
    %33 = tpu.dynamic_rotate %27 by %c60_i32_15 dim 0 : vector<64x16xf32>, i32 -> vector<64x16xf32>
    %c59_i32_16 = arith.constant 59 : i32
    %34 = tpu.dynamic_rotate %27 by %c59_i32_16 dim 0 : vector<64x16xf32>, i32 -> vector<64x16xf32>
    %c58_i32_17 = arith.constant 58 : i32
    %35 = tpu.dynamic_rotate %27 by %c58_i32_17 dim 0 : vector<64x16xf32>, i32 -> vector<64x16xf32>
    %cst_18 = arith.constant 1.000000e+00 : f32
    %36 = vector.broadcast %cst_18 : f32 to vector<64x1xf32>
    %37 = tpu.concatenate %28, %29, %30, %31, %27, %32, %33, %34, %35, %36 in 1 : vector<64x16xf32>, vector<64x16xf32>, vector<64x16xf32>, vector<64x16xf32>, vector<64x16xf32>, vector<64x16xf32>, vector<64x16xf32>, vector<64x16xf32>, vector<64x16xf32>, vector<64x1xf32> -> vector<64x145xf32>
    %c0_19 = arith.constant 0 : index
    %c0_20 = arith.constant 0 : index
    %38 = vector.load %arg3[%c0_19, %c0_20] : memref<64x145xf32, #tpu.memory_space<vmem>>, vector<64x145xf32>
    %39 = arith.mulf %37, %38 : vector<64x145xf32>
    %c0_21 = arith.constant 0 : index
    %c0_22 = arith.constant 0 : index
    %40 = vector.load %arg4[%c0_21, %c0_22] : memref<145x32xf32, #tpu.memory_space<vmem>>, vector<145x32xf32>
    %cst_23 = arith.constant dense<0.000000e+00> : vector<64x32xf32>
    %41 = tpu.matmul %39, %40, %cst_23 {dimension_numbers = #tpu.dot_dimension_numbers<[1], [0], [0], [1], [0, 0, 1, 1], [], []>} : vector<64x145xf32>, vector<145x32xf32>, vector<64x32xf32> -> vector<64x32xf32>
    %cst_24 = arith.constant 5.000000e-01 : f32
    %42 = vector.broadcast %cst_24 : f32 to vector<64x32xf32>
    %43 = arith.mulf %42, %41 : vector<64x32xf32>
    %cst_25 = arith.constant 4.471500e-02 : f32
    %44 = vector.broadcast %cst_25 : f32 to vector<64x32xf32>
    %45 = arith.mulf %44, %41 : vector<64x32xf32>
    %46 = arith.mulf %45, %41 : vector<64x32xf32>
    %47 = arith.mulf %46, %41 : vector<64x32xf32>
    %48 = arith.addf %41, %47 : vector<64x32xf32>
    %cst_26 = arith.constant 0.797884583 : f32
    %49 = vector.broadcast %cst_26 : f32 to vector<64x32xf32>
    %50 = arith.mulf %49, %48 : vector<64x32xf32>
    %51 = math.tanh %50 : vector<64x32xf32>
    %cst_27 = arith.constant 1.000000e+00 : f32
    %52 = vector.broadcast %cst_27 : f32 to vector<64x32xf32>
    %53 = arith.addf %52, %51 : vector<64x32xf32>
    %54 = arith.mulf %43, %53 : vector<64x32xf32>
    %c6_i32_28 = arith.constant 6 : i32
    %55 = tpu.dynamic_rotate %54 by %c6_i32_28 dim 0 : vector<64x32xf32>, i32 -> vector<64x32xf32>
    %c5_i32_29 = arith.constant 5 : i32
    %56 = tpu.dynamic_rotate %54 by %c5_i32_29 dim 0 : vector<64x32xf32>, i32 -> vector<64x32xf32>
    %c4_i32_30 = arith.constant 4 : i32
    %57 = tpu.dynamic_rotate %54 by %c4_i32_30 dim 0 : vector<64x32xf32>, i32 -> vector<64x32xf32>
    %c1_i32_31 = arith.constant 1 : i32
    %58 = tpu.dynamic_rotate %54 by %c1_i32_31 dim 0 : vector<64x32xf32>, i32 -> vector<64x32xf32>
    %c63_i32_32 = arith.constant 63 : i32
    %59 = tpu.dynamic_rotate %54 by %c63_i32_32 dim 0 : vector<64x32xf32>, i32 -> vector<64x32xf32>
    %c60_i32_33 = arith.constant 60 : i32
    %60 = tpu.dynamic_rotate %54 by %c60_i32_33 dim 0 : vector<64x32xf32>, i32 -> vector<64x32xf32>
    %c59_i32_34 = arith.constant 59 : i32
    %61 = tpu.dynamic_rotate %54 by %c59_i32_34 dim 0 : vector<64x32xf32>, i32 -> vector<64x32xf32>
    %c58_i32_35 = arith.constant 58 : i32
    %62 = tpu.dynamic_rotate %54 by %c58_i32_35 dim 0 : vector<64x32xf32>, i32 -> vector<64x32xf32>
    %cst_36 = arith.constant 1.000000e+00 : f32
    %63 = vector.broadcast %cst_36 : f32 to vector<64x1xf32>
    %64 = tpu.concatenate %55, %56, %57, %58, %54, %59, %60, %61, %62, %63 in 1 : vector<64x32xf32>, vector<64x32xf32>, vector<64x32xf32>, vector<64x32xf32>, vector<64x32xf32>, vector<64x32xf32>, vector<64x32xf32>, vector<64x32xf32>, vector<64x32xf32>, vector<64x1xf32> -> vector<64x289xf32>
    %c0_37 = arith.constant 0 : index
    %c0_38 = arith.constant 0 : index
    %65 = vector.load %arg5[%c0_37, %c0_38] : memref<64x289xf32, #tpu.memory_space<vmem>>, vector<64x289xf32>
    %66 = arith.mulf %64, %65 : vector<64x289xf32>
    %c0_39 = arith.constant 0 : index
    %c0_40 = arith.constant 0 : index
    %67 = vector.load %arg6[%c0_39, %c0_40] : memref<289x64xf32, #tpu.memory_space<vmem>>, vector<289x64xf32>
    %cst_41 = arith.constant dense<0.000000e+00> : vector<64x64xf32>
    %68 = tpu.matmul %66, %67, %cst_41 {dimension_numbers = #tpu.dot_dimension_numbers<[1], [0], [0], [1], [0, 0, 1, 1], [], []>} : vector<64x289xf32>, vector<289x64xf32>, vector<64x64xf32> -> vector<64x64xf32>
    %cst_42 = arith.constant 5.000000e-01 : f32
    %69 = vector.broadcast %cst_42 : f32 to vector<64x64xf32>
    %70 = arith.mulf %69, %68 : vector<64x64xf32>
    %cst_43 = arith.constant 4.471500e-02 : f32
    %71 = vector.broadcast %cst_43 : f32 to vector<64x64xf32>
    %72 = arith.mulf %71, %68 : vector<64x64xf32>
    %73 = arith.mulf %72, %68 : vector<64x64xf32>
    %74 = arith.mulf %73, %68 : vector<64x64xf32>
    %75 = arith.addf %68, %74 : vector<64x64xf32>
    %cst_44 = arith.constant 0.797884583 : f32
    %76 = vector.broadcast %cst_44 : f32 to vector<64x64xf32>
    %77 = arith.mulf %76, %75 : vector<64x64xf32>
    %78 = math.tanh %77 : vector<64x64xf32>
    %cst_45 = arith.constant 1.000000e+00 : f32
    %79 = vector.broadcast %cst_45 : f32 to vector<64x64xf32>
    %80 = arith.addf %79, %78 : vector<64x64xf32>
    %81 = arith.mulf %70, %80 : vector<64x64xf32>
    %c0_46 = arith.constant 0 : index
    %c0_47 = arith.constant 0 : index
    %82 = vector.load %arg7[%c0_46, %c0_47] : memref<2x64xf32, #tpu.memory_space<vmem>>, vector<2x64xf32>
    %cst_48 = arith.constant dense<0.000000e+00> : vector<2x64xf32>
    %83 = tpu.matmul %82, %81, %cst_48 {dimension_numbers = #tpu.dot_dimension_numbers<[1], [0], [0], [1], [0, 0, 1, 1], [], []>} : vector<2x64xf32>, vector<64x64xf32>, vector<2x64xf32> -> vector<2x64xf32>
    %c0_49 = arith.constant 0 : index
    %c0_50 = arith.constant 0 : index
    %84 = vector.load %arg8[%c0_49, %c0_50] : memref<64x32xf32, #tpu.memory_space<vmem>>, vector<64x32xf32>
    %cst_51 = arith.constant dense<0.000000e+00> : vector<2x32xf32>
    %85 = tpu.matmul %83, %84, %cst_51 {dimension_numbers = #tpu.dot_dimension_numbers<[1], [0], [0], [1], [0, 0, 1, 1], [], []>} : vector<2x64xf32>, vector<64x32xf32>, vector<2x32xf32> -> vector<2x32xf32>
    %cst_52 = arith.constant dense<0xFF800000> : vector<2xf32>
    %86 = vector.multi_reduction <maximumf>, %85, %cst_52 [1] : vector<2x32xf32> to vector<2xf32>
    %87 = vector.shape_cast %86 : vector<2xf32> to vector<2x1xf32>
    %88 = vector.broadcast %87 : vector<2x1xf32> to vector<2x32xf32>
    %89 = arith.subf %85, %88 : vector<2x32xf32>
    %90 = math.exp %89 : vector<2x32xf32>
    %c0_53 = arith.constant 0 : index
    %c0_54 = arith.constant 0 : index
    %91 = vector.load %arg9[%c0_53, %c0_54] : memref<32x32xf32, #tpu.memory_space<vmem>>, vector<32x32xf32>
    %cst_55 = arith.constant dense<0.000000e+00> : vector<2x32xf32>
    %92 = tpu.matmul %90, %91, %cst_55 {dimension_numbers = #tpu.dot_dimension_numbers<[1], [0], [0], [1], [0, 0, 1, 1], [], []>} : vector<2x32xf32>, vector<32x32xf32>, vector<2x32xf32> -> vector<2x32xf32>
    %93 = arith.divf %90, %92 : vector<2x32xf32>
    %c0_56 = arith.constant 0 : index
    %c0_57 = arith.constant 0 : index
    %94 = vector.load %arg10[%c0_56, %c0_57] : memref<2x32xf32, #tpu.memory_space<vmem>>, vector<2x32xf32>
    tpu.vector_store %arg10[%c0_56, %c0_57], %93 {strides = array<i32>} : memref<2x32xf32, #tpu.memory_space<vmem>>, vector<2x32xf32>,
    return
  }
}

</mosaic_0001>

<bundles_post_ra>
// kernel: latent_encoder_pallas.1
= control target key start
LH: loop header
LB: loop body
LE: loop exit
PB: predicated region body
PF: predicated region fallthrough
CT: control target
= control target key end

     0   :  { %v52_v2 = vlaneseq  ;;  %s2783_s19 = smov 6   ;;  %s2784_s20 = smov 3   ;;  %s4691_s0 = inlined_call_operand.vmem [shape: f32[64,3], index: 0, kind: input, shape index: {}]   ;;  %s4692_s1 = inlined_call_operand.vmem [shape: f32[64,28], index: 1, kind: input, shape index: {}]   ;;  %s4693_s2 = inlined_call_operand.vmem [shape: f32[28,16], index: 2, kind: input, shape index: {}]   ;;  %s4694_s3 = inlined_call_operand.vmem [shape: f32[64,145], index: 3, kind: input, shape index: {}]   ;;  %s4695_s4 = inlined_call_operand.vmem [shape: f32[145,32], index: 4, kind: input, shape index: {}]   ;;  %s4696_s5 = inlined_call_operand.vmem [shape: f32[64,289], index: 5, kind: input, shape index: {}]   ;;  %s4697_s6 = inlined_call_operand.vmem [shape: f32[289,64], index: 6, kind: input, shape index: {}]   ;;  %s4698_s7 = inlined_call_operand.vmem [shape: f32[2,64], index: 7, kind: input, shape index: {}]   ;;  %s4699_s8 = inlined_call_operand.vmem [shape: f32[64,32], index: 8, kind: input, shape index: {}]   ;;  %s4700_s9 = inlined_call_operand.vmem [shape: f32[32,32], index: 9, kind: input, shape index: {}]   ;;  %s4701_s10 = inlined_call_operand.hbm [shape: f32[2,32], index: 10, kind: output, shape index: {}]  }
   0x1   :  { %v2861_v0 = vld [vmem:[%s4691_s0] sm:$0xff]  ;;  %v2866_v1 = vld [vmem:[%s4691_s0 + $0x38] sm:$0xff]  ;;  %v2871_v3 = vld [vmem:[%s4691_s0 + $0x8] sm:$0xff] }
   0x2   :  { %v80_v4 = vrot.slane %v2861_v0, 4  ;;  %v87_v5 = vrot.slane %v2866_v1, 4  ;;  %v63_v6 = vrot.slane %v2861_v0, 3  ;;  %v70_v7 = vrot.slane %v2866_v1, 3 }
   0x3   :  { %v2877_v8 = vshrl.u32 %v52_v2, 7  ;;  %v81_v9 = vrot.slane %v2871_v3, 4  ;;  %v64_v10 = vrot.slane %v2871_v3, 3  ;;  %v97_v13 = vrot.slane %v2861_v0, 7 }
   0x5   :  { %vm88_vm0 = vcmp.lt.s32.totalorder %v2877_v8, 4  ;;  %vm71_vm1 = vcmp.lt.s32.totalorder %v2877_v8, 5 }
   0x6   :  { %v2887_v11 = vsel %vm88_vm0, %v87_v5, %v80_v4  ;;  %v79_v12 = vsel %vm71_vm1, %v70_v7, %v63_v6 }
   0x7   :  { %205 = vrot.lane.b32.xlu1 %v2887_v11, %s2783_s19  ;;  %173 = vrot.lane.b32.xlu0 %v79_v12, %s2784_s20 }
   0x8   :  { %15 = vsyncpa [#allocation3], 0  ;;  %v95_v14 = vsel %vm88_vm0, %v80_v4, %v81_v9  ;;  %v78_v15 = vsel %vm71_vm1, %v63_v6, %v64_v10  ;;  %v98_v16 = vrot.slane %v2871_v3, 7  ;;  %v104_v17 = vrot.slane %v2866_v1, 7  ;;  %v2907_v18 = vld [vmem:[%s4691_s0 + $0x10] sm:$0xff]  ;;  %s2785_s23 = smov 9  }
   0x9   :  { %vm105_vm2 = vcmp.lt.s32.totalorder %v2877_v8, 1  ;;  %v65_v21 = vrot.slane %v2907_v18, 3  ;;  %v114_v23 = vrot.slane %v2861_v0, 1  ;;  %v115_v24 = vrot.slane %v2871_v3, 1  ;;  %v2928_v25 = vld [vmem:[%s4691_s0 + $0x18] sm:$0xff]  ;;  %s2786_s26 = smov 12  }
   0xa   :  { %v112_v19 = vsel %vm105_vm2, %v97_v13, %v98_v16  ;;  %v113_v20 = vsel %vm105_vm2, %v104_v17, %v97_v13  ;;  %vm122_vm3 = vcmp.lt.s32.totalorder %v2877_v8, 7  ;;  %v82_v27 = vrot.slane %v2907_v18, 4  ;;  %s2787_s27 = smov 15   ;;  %s2788_s28 = smov 18   ;;  %v2990_v46 = vld [vmem:[%s4691_s0 + $0x20] sm:$0xff]  ;;  %v511_v49 = vld [vmem:[%s4693_s2 + $0x8] sm:$0xff] }
   0xb   :  { %207 = vrot.lane.b32.xlu1 %v95_v14, %s2783_s19  ;;  %175 = vrot.lane.b32.xlu0 %v78_v15, %s2784_s20  ;;  %v77_v22 = vsel %vm71_vm1, %v64_v10, %v65_v21  ;;  %v129_v26 = vsel %vm122_vm3, %v114_v23, %v115_v24  ;;  %v66_v28 = vrot.slane %v2928_v25, 3  ;;  %v116_v31 = vrot.slane %v2907_v18, 1  ;;  %v510_v48 = vld [vmem:[%s4693_s2] sm:$0xff]  ;;  %s2789_s15 = smov 21   ;;  %v512_v57 = vld [vmem:[%s4693_s2 + $0x10] sm:$0xff]  ;;  %s2793_s22 = smov 16  }
   0xc   :  { %v94_v29 = vsel %vm88_vm0, %v81_v9, %v82_v27  ;;  %v99_v32 = vrot.slane %v2907_v18, 7  ;;  %v44_v33 = vrot.slane %v2861_v0, 2  ;;  %v45_v34 = vrot.slane %v2871_v3, 2  ;;  %v513_v58 = vld [vmem:[%s4693_s2 + $0x18] sm:$0xf]  ;;  %s2791_s2 = smov 24  }
   0xd   :  { %v76_v30 = vsel %vm71_vm1, %v65_v21, %v66_v28  ;;  %v128_v35 = vsel %vm122_vm3, %v115_v24, %v116_v31  ;;  %v83_v36 = vrot.slane %v2928_v25, 4  ;;  %vm54_vm4 = vcmp.lt.s32.totalorder %v2877_v8, 6  ;;  %v3047_v6 = vld [vmem:[%s4691_s0 + $0x28] sm:$0xff]  ;;  %s2794_s24 = smov 80   ;;  %s2795_s25 = smov 32  }
   0xe   :  { %v46_v37 = vrot.slane %v2907_v18, 2  ;;  %v2965_v38 = vsel %vm54_vm4, %v44_v33, %v45_v34  ;;  %v47_v40 = vrot.slane %v2928_v25, 2  ;;  %v131_v41 = vrot.slane %v2861_v0, 5  ;;  %s2796_s29 = smov 96  }
   0xf   :  { %239 = vrot.lane.b32.xlu1 %v112_v19, %s2785_s23  ;;  %237 = vrot.lane.b32.xlu0 %v113_v20, %s2785_s23  ;;  %v111_v42 = vsel %vm105_vm2, %v98_v16, %v99_v32  ;;  %v93_v43 = vsel %vm88_vm0, %v82_v27, %v83_v36  ;;  %v132_v44 = vrot.slane %v2871_v3, 5  ;;  %vm4702_vm5 = vcmp.lt.s32.totalorder %v2877_v8, 3 }
  0x10   :  { %v2969_v39 = vsel %vm54_vm4, %v45_v34, %v46_v37  ;;  %v2984_v45 = vsel %vm54_vm4, %v46_v37, %v47_v40  ;;  %v48_v47 = vrot.slane %v2990_v46, 2  ;;  %v100_v51 = vrot.slane %v2928_v25, 7 }
  0x11   :  { %v146_v50 = vsel %vm4702_vm5, %v131_v41, %v132_v44  ;;  %v2580_v52 = vpack.c.bf16 %v511_v49, %v510_v48  ;;  %v148_v54 = vrot.slane %v2861_v0, 6  ;;  %v149_v55 = vrot.slane %v2871_v3, 6 }
  0x12   :  { %v3010_v53 = vsel %vm54_vm4, %v47_v40, %v48_v47  ;;  %v133_v56 = vrot.slane %v2907_v18, 5  ;;  %v110_v59 = vsel %vm105_vm2, %v99_v32, %v100_v51  ;;  %vm539_vm6 = vcmask 1043456  }
  0x13   :  { %177 = vrot.lane.b32.xlu1 %v77_v22, %s2784_s20  ;;  %269 = vrot.lane.b32.xlu0 %v2861_v0, %s2786_s26  ;;  %v2584_v60 = vpack.c.bf16 %v513_v58, %v512_v57  ;;  %vm156_vm7 = vcmp.lt.s32.totalorder %v2877_v8, 2  ;;  %vm2790_vm8 = vmmov 1   ;;  %v67_v63 = vrot.slane %v2990_v46, 3 }
  0x14   :  { %2581 = vmatprep.subr.bf16.mxu0 %v2580_v52  ;;  %vm2585_vm9 = vmpackc.low %vm539_vm6, %vm2790_vm8  ;;  %v163_v61 = vsel %vm156_vm7, %v148_v54, %v149_v55  ;;  %v145_v62 = vsel %vm4702_vm5, %v132_v44, %v133_v56  ;;  %v117_v4 = vrot.slane %v2928_v25, 1  ;;  %v84_v12 = vrot.slane %v2990_v46, 4 }
  0x15   :  { %2583 = vmatpush3.bf16.msra.mxu0 %v2580_v52  ;;  %v75_v2 = vsel %vm71_vm1, %v66_v28, %v67_v63  ;;  %v68_v13 = vrot.slane %v3047_v6, 3  ;;  %v118_v16 = vrot.slane %v2990_v46, 1  ;;  %v101_v19 = vrot.slane %v2990_v46, 7 }
  0x16   :  { %2586 = vmatprep.subr.msk.bf16.mxu0 %vm2585_vm9, %v2584_v60  ;;  %v127_v10 = vsel %vm122_vm3, %v116_v31, %v117_v4  ;;  %v85_v20 = vrot.slane %v3047_v6, 4  ;;  %v134_v24 = vrot.slane %v2928_v25, 5  ;;  %v102_v27 = vrot.slane %v3047_v6, 7  ;;  %v3096_v31 = vld [vmem:[%s4691_s0 + $0x30] sm:$0xff]  ;;  %s2797_s0 = smov 48  }
  0x17   :  { %301 = vrot.lane.b32.xlu1 %v129_v26, %s2787_s27  ;;  %271 = vrot.lane.b32.xlu0 %v2871_v3, %s2786_s26  ;;  %v150_v3 = vrot.slane %v2907_v18, 6  ;;  %v74_v15 = vsel %vm71_vm1, %v67_v63, %v68_v13  ;;  %v109_v21 = vsel %vm105_vm2, %v100_v51, %v101_v19  ;;  %v119_v37 = vrot.slane %v3047_v6, 1 }
  0x18   :  { %v91_v22 = vsel %vm88_vm0, %v84_v12, %v85_v20  ;;  %v144_v26 = vsel %vm4702_vm5, %v133_v56, %v134_v24  ;;  %v108_v28 = vsel %vm105_vm2, %v101_v19, %v102_v27  ;;  %v120_v49 = vrot.slane %v3096_v31, 1 }
  0x19   :  { %2589 = vmatpush3.bf16.msk.msra.mxu0 %vm2585_vm9, %v2584_v60  ;;  %v162_v9 = vsel %vm156_vm7, %v149_v55, %v150_v3  ;;  %v103_v51 = vrot.slane %v3096_v31, 7  ;;  %v136_v55 = vrot.slane %v3047_v6, 5  ;;  %v137_v58 = vrot.slane %v3096_v31, 5 }
  0x1a   :  { %vm413_vm10 = vcmask 23552   ;;  %vm422_vm11 = vcmask 48128   ;;  %vm431_vm12 = vcmask 72704   ;;  %vm440_vm13 = vcmask 97280  }
  0x1b   :  { %209 = vrot.lane.b32.xlu1 %v94_v29, %s2783_s19  ;;  %179 = vrot.lane.b32.xlu0 %v76_v30, %s2784_s20  ;;  %v135_v30 = vrot.slane %v2990_v46, 5  ;;  %v107_v52 = vsel %vm105_vm2, %v102_v27, %v103_v51  ;;  %v106_v57 = vsel %vm105_vm2, %v103_v51, %v104_v17  ;;  %v141_v60 = vsel %vm4702_vm5, %v136_v55, %v137_v58 }
  0x1c   :  { %vm449_vm14 = vcmask 121856   ;;  %vm458_vm15 = vcmask 146432   ;;  %vm467_vm6 = vcmask 171008   ;;  %vm476_vm8 = vcmask 195584  }
  0x1d   :  { %v143_v34 = vsel %vm4702_vm5, %v134_v24, %v135_v30  ;;  %v142_v56 = vsel %vm4702_vm5, %v135_v30, %v136_v55  ;;  %vm485_vm9 = vcmask 220160  }
  0x1f   :  { %325 = vrot.lane.b32.xlu1 %v95_v14, %s2788_s28  ;;  %303 = vrot.lane.b32.xlu0 %v128_v35, %s2787_s27  ;;  %v92_v14 = vsel %vm88_vm0, %v83_v36, %v84_v12  ;;  %v152_v36 = vrot.slane %v2990_v46, 6  ;;  %v155_v12 = vrot.slane %v2866_v1, 6 }
  0x23   :  { %241 = vrot.lane.b32.xlu1 %v111_v42, %s2785_s23  ;;  %211 = vrot.lane.b32.xlu0 %v93_v43, %s2783_s19  ;;  %v125_v42 = vsel %vm122_vm3, %v118_v16, %v119_v37 }
  0x27   :  { %357 = vrot.lane.b32.xlu1 %v146_v50, %s2789_s15  ;;  %327 = vrot.lane.b32.xlu0 %v94_v29, %s2788_s28  ;;  %v151_v29 = vrot.slane %v2928_v25, 6  ;;  %v124_v50 = vsel %vm122_vm3, %v119_v37, %v120_v49 }
  0x29   :  { %v161_v32 = vsel %vm156_vm7, %v150_v3, %v151_v29  ;;  %v160_v40 = vsel %vm156_vm7, %v151_v29, %v152_v36  ;;  %v138_v3 = vrot.slane %v2866_v1, 5 }
  0x2b   :  { %273 = vrot.lane.b32.xlu1 %v2907_v18, %s2786_s26  ;;  %243 = vrot.lane.b32.xlu0 %v110_v59, %s2785_s23  ;;  %v126_v18 = vsel %vm122_vm3, %v117_v4, %v118_v16 }
  0x2f   :  { %389 = vrot.lane.b32.xlu1 %v163_v61, %s2791_s2  ;;  %359 = vrot.lane.b32.xlu0 %v145_v62, %s2789_s15  ;;  %v121_v61 = vrot.slane %v2866_v1, 1  ;;  %v154_v62 = vrot.slane %v3096_v31, 6 }
  0x31   :  { %v123_v17 = vsel %vm122_vm3, %v120_v49, %v121_v61  ;;  %v130_v63 = vsel %vm122_vm3, %v121_v61, %v114_v23  ;;  %v147_v23 = vsel %vm4702_vm5, %v138_v3, %v131_v41  ;;  %v495_v61 = vld [vmem:[%s4692_s1 + $0x8] sm:$0xff] }
  0x33   :  { %275 = vrot.lane.b32.xlu1 %v2928_v25, %s2786_s26  ;;  %181 = vrot.lane.b32.xlu0 %v75_v2, %s2784_s20  ;;  %v69_v25 = vrot.slane %v3096_v31, 3 }
  0x35   :  { %v73_v35 = vsel %vm71_vm1, %v68_v13, %v69_v25  ;;  %v72_v48 = vsel %vm71_vm1, %v69_v25, %v70_v7 }
  0x37   :  { %391 = vrot.lane.b32.xlu1 %v162_v9, %s2791_s2  ;;  %305 = vrot.lane.b32.xlu0 %v127_v10, %s2787_s27  ;;  %v140_v10 = vsel %vm4702_vm5, %v137_v58, %v138_v3  ;;  %vm514_vm5 = vcmask 228352  }
  0x3b   :  { %213 = vrot.lane.b32.xlu1 %v92_v14, %s2783_s19  ;;  %183 = vrot.lane.b32.xlu0 %v74_v15, %s2784_s20  ;;  %v157_v15 = vsel %vm156_vm7, %v154_v62, %v155_v12 }
  0x3f   :  { %329 = vrot.lane.b32.xlu1 %v93_v43, %s2788_s28  ;;  %307 = vrot.lane.b32.xlu0 %v126_v18, %s2787_s27  ;;  %v86_v43 = vrot.slane %v3096_v31, 4 }
  0x41   :  { %v90_v44 = vsel %vm88_vm0, %v85_v20, %v86_v43  ;;  %v89_v7 = vsel %vm88_vm0, %v86_v43, %v87_v5  ;;  %v153_v5 = vrot.slane %v3047_v6, 6 }
  0x43   :  { %245 = vrot.lane.b32.xlu1 %v109_v21, %s2785_s23  ;;  %215 = vrot.lane.b32.xlu0 %v91_v22, %s2783_s19  ;;  %v159_v59 = vsel %vm156_vm7, %v152_v36, %v153_v5  ;;  %v158_v2 = vsel %vm156_vm7, %v153_v5, %v154_v62 }
  0x47   :  { %361 = vrot.lane.b32.xlu1 %v144_v26, %s2789_s15  ;;  %331 = vrot.lane.b32.xlu0 %v92_v14, %s2788_s28 }
  0x4b   :  { %277 = vrot.lane.b32.xlu1 %v2990_v46, %s2786_s26  ;;  %247 = vrot.lane.b32.xlu0 %v108_v28, %s2785_s23 }
  0x4f   :  { %393 = vrot.lane.b32.xlu1 %v161_v32, %s2791_s2  ;;  %363 = vrot.lane.b32.xlu0 %v143_v34, %s2789_s15 }
  0x53   :  { %279 = vrot.lane.b32.xlu1 %v3047_v6, %s2786_s26  ;;  %185 = vrot.lane.b32.xlu0 %v73_v35, %s2784_s20 }
  0x57   :  { %395 = vrot.lane.b32.xlu1 %v160_v40, %s2791_s2  ;;  %309 = vrot.lane.b32.xlu0 %v125_v42, %s2787_s27 }
  0x5b   :  { %217 = vrot.lane.b32.xlu1 %v90_v44, %s2783_s19  ;;  %187 = vrot.lane.b32.xlu0 %v72_v48, %s2784_s20 }
  0x5f   :  { %333 = vrot.lane.b32.xlu1 %v91_v22, %s2788_s28  ;;  %311 = vrot.lane.b32.xlu0 %v124_v50, %s2787_s27  ;;  %v494_v50 = vld [vmem:[%s4692_s1] sm:$0xff] }
  0x63   :  { %249 = vrot.lane.b32.xlu1 %v107_v52, %s2785_s23  ;;  %219 = vrot.lane.b32.xlu0 %v89_v7, %s2783_s19  ;;  %s2798_s19 = smov 112  }
  0x67   :  { %365 = vrot.lane.b32.xlu1 %v142_v56, %s2789_s15  ;;  %335 = vrot.lane.b32.xlu0 %v90_v44, %s2788_s28 }
  0x6b   :  { %281 = vrot.lane.b32.xlu1 %v3096_v31, %s2786_s26  ;;  %251 = vrot.lane.b32.xlu0 %v106_v57, %s2785_s23 }
  0x6f   :  { %397 = vrot.lane.b32.xlu1 %v159_v59, %s2791_s2  ;;  %367 = vrot.lane.b32.xlu0 %v141_v60, %s2789_s15 }
  0x73   :  { %313 = vrot.lane.b32.xlu1 %v123_v17, %s2787_s27  ;;  %283 = vrot.lane.b32.xlu0 %v2866_v1, %s2786_s26 }
  0x77   :  { %315 = vrot.lane.b32.xlu1 %v130_v63, %s2787_s27  ;;  %399 = vrot.lane.b32.xlu0 %v158_v2, %s2791_s2 }
  0x79   :  { %v206_v4 = vpop.permute.xlu1 %205  ;;  %v174_v9 = vpop.permute.xlu0 %173 }
  0x7b   :  { %339 = vrot.lane.b32.xlu1 %v2887_v11, %s2788_s28  ;;  %337 = vrot.lane.b32.xlu0 %v89_v7, %s2788_s28  ;;  %v164_v11 = vsel %vm156_vm7, %v155_v12, %v148_v54  ;;  %v51_v54 = vrot.slane %v2866_v1, 2 }
  0x7d   :  { %v208_v13 = vpop.permute.xlu1 %207  ;;  %v176_v14 = vpop.permute.xlu0 %175  ;;  %v62_v30 = vsel %vm54_vm4, %v51_v54, %v44_v33 }
  0x7e   :  { %v414_v32 = vsel %vm413_vm10, %v62_v30, %v174_v9  ;;  %v415_v43 = vsel %vm413_vm10, %v2965_v38, %v176_v14 }
  0x7f   :  { %371 = vrot.lane.b32.xlu1 %v147_v23, %s2789_s15  ;;  %369 = vrot.lane.b32.xlu0 %v140_v10, %s2789_s15  ;;  %v423_v35 = vsel %vm422_vm11, %v414_v32, %v206_v4  ;;  %v424_v7 = vsel %vm422_vm11, %v415_v43, %v208_v13  ;;  %v496_v32 = vld [vmem:[%s4692_s1 + $0x10] sm:$0xff] }
  0x81   :  { %v240_v41 = vpop.permute.xlu1 %239  ;;  %v238_v16 = vpop.permute.xlu0 %237 }
  0x82   :  { %v432_v36 = vsel %vm431_vm12, %v423_v35, %v238_v16  ;;  %v433_v56 = vsel %vm431_vm12, %v424_v7, %v240_v41 }
  0x83   :  { %403 = vrot.lane.b32.xlu1 %v164_v11, %s2791_s2  ;;  %401 = vrot.lane.b32.xlu0 %v157_v15, %s2791_s2 }
  0x85   :  { %v3200_v18 = vpop.permute.xlu1 %177  ;;  %v270_v19 = vpop.permute.xlu0 %269 }
  0x86   :  { %v441_v40 = vsel %vm440_vm13, %v432_v36, %v270_v19  ;;  %v416_v15 = vsel %vm413_vm10, %v2969_v39, %v3200_v18 }
  0x89   :  { %v302_v20 = vpop.permute.xlu1 %301  ;;  %v272_v21 = vpop.permute.xlu0 %271 }
  0x8a   :  { %v450_v33 = vsel %vm449_vm14, %v441_v40, %v302_v20  ;;  %v442_v5 = vsel %vm440_vm13, %v433_v56, %v272_v21 }
  0x8d   :  { %v210_v22 = vpop.permute.xlu1 %209  ;;  %v3202_v24 = vpop.permute.xlu0 %179 }
  0x8e   :  { %v425_v41 = vsel %vm422_vm11, %v416_v15, %v210_v22  ;;  %v417_v22 = vsel %vm413_vm10, %v2984_v45, %v3202_v24  ;;  %v497_v24 = vld [vmem:[%s4692_s1 + $0x18] sm:$0xff] }
  0x91   :  { %v326_v26 = vpop.permute.xlu1 %325  ;;  %v304_v27 = vpop.permute.xlu0 %303 }
  0x92   :  { %v459_v42 = vsel %vm458_vm15, %v450_v33, %v326_v26  ;;  %v451_v58 = vsel %vm449_vm14, %v442_v5, %v304_v27 }
  0x95   :  { %v242_v28 = vpop.permute.xlu1 %241  ;;  %v3205_v29 = vpop.permute.xlu0 %211 }
  0x96   :  { %v434_v16 = vsel %vm431_vm12, %v425_v41, %v242_v28 }
  0x99   :  { %v358_v34 = vpop.permute.xlu1 %357  ;;  %v328_v25 = vpop.permute.xlu0 %327 }
  0x9a   :  { %v468_v44 = vsel %vm467_vm6, %v459_v42, %v358_v34  ;;  %v460_v59 = vsel %vm458_vm15, %v451_v58, %v328_v25  ;;  %v426_v25 = vsel %vm422_vm11, %v417_v22, %v3205_v29 }
  0x9d   :  { %v274_v37 = vpop.permute.xlu1 %273  ;;  %v244_v0 = vpop.permute.xlu0 %243 }
  0x9e   :  { %v443_v21 = vsel %vm440_vm13, %v434_v16, %v274_v37  ;;  %v435_v36 = vsel %vm431_vm12, %v426_v25, %v244_v0 }
  0xa1   :  { %v390_v48 = vpop.permute.xlu1 %389  ;;  %v360_v49 = vpop.permute.xlu0 %359 }
  0xa2   :  { %v477_v51 = vsel %vm476_vm8, %v468_v44, %v390_v48  ;;  %v469_v60 = vsel %vm467_vm6, %v460_v59, %v360_v49 }
  0xa3   :  { %v486_v52 = vsel %vm485_vm9, %v477_v51, 1.0 }
  0xa4   :  { %v502_v55 = vmul.f32 %v494_v50, %v486_v52 }
  0xa5   :  { %v276_v57 = vpop.permute.xlu1 %275  ;;  %v182_v38 = vpop.permute.xlu0 %181 }
  0xa6   :  { %2497 = vmatprep.mubr.msk.f32.mxu0 %vm514_vm5, %v502_v55  ;;  %v444_v33 = vsel %vm440_vm13, %v435_v36, %v276_v57  ;;  %v418_v58 = vsel %vm413_vm10, %v3010_v53, %v182_v38 }
  0xa9   :  { %v392_v17 = vpop.permute.xlu1 %391  ;;  %v306_v62 = vpop.permute.xlu0 %305 }
  0xaa   :  { %v478_v63 = vsel %vm476_vm8, %v469_v60, %v392_v17  ;;  %v452_v26 = vsel %vm449_vm14, %v443_v21, %v306_v62  ;;  %v49_v60 = vrot.slane %v3047_v6, 2  ;;  %v498_v6 = vld [vmem:[%s4692_s1 + $0x20] sm:$0xff]  ;;  %v50_v21 = vrot.slane %v3096_v31, 2 }
  0xab   :  { %v487_v2 = vsel %vm485_vm9, %v478_v63, 1.0 }
  0xac   :  { %v503_v3 = vmul.f32 %v495_v61, %v487_v2  ;;  %v55_v31 = vsel %vm54_vm4, %v50_v21, %v51_v54 }
  0xad   :  { %v214_v4 = vpop.permute.xlu1 %213  ;;  %v3239_v9 = vpop.permute.xlu0 %183 }
  0xae   :  { %2498 = vmatmul.mubr.msk.f32.vlgmr.msra.gmra.mrb[0].mxu0 %vm514_vm5, %v503_v3  ;;  %v427_v59 = vsel %vm422_vm11, %v418_v58, %v214_v4  ;;  %v57_v3 = vsel %vm54_vm4, %v48_v47, %v49_v60 }
  0xb1   :  { %v330_v23 = vpop.permute.xlu1 %329  ;;  %v308_v10 = vpop.permute.xlu0 %307 }
  0xb2   :  { %v461_v27 = vsel %vm458_vm15, %v452_v26, %v330_v23  ;;  %v453_v42 = vsel %vm449_vm14, %v444_v33, %v308_v10 }
  0xb5   :  { %v246_v12 = vpop.permute.xlu1 %245  ;;  %v216_v13 = vpop.permute.xlu0 %215 }
  0xb6   :  { %v436_v61 = vsel %vm431_vm12, %v427_v59, %v246_v12  ;;  %v419_v12 = vsel %vm413_vm10, %v57_v3, %v3239_v9 }
  0xb9   :  { %v362_v14 = vpop.permute.xlu1 %361  ;;  %v332_v11 = vpop.permute.xlu0 %331 }
  0xba   :  { %v470_v30 = vsel %vm467_vm6, %v461_v27, %v362_v14  ;;  %v462_v43 = vsel %vm458_vm15, %v453_v42, %v332_v11  ;;  %v428_v14 = vsel %vm422_vm11, %v419_v12, %v216_v13  ;;  %v499_v13 = vld [vmem:[%s4692_s1 + $0x28] sm:$0xff] }
  0xbd   :  { %v278_v19 = vpop.permute.xlu1 %277  ;;  %v248_v20 = vpop.permute.xlu0 %247 }
  0xbe   :  { %v445_v63 = vsel %vm440_vm13, %v436_v61, %v278_v19  ;;  %v437_v11 = vsel %vm431_vm12, %v428_v14, %v248_v20 }
  0xc1   :  { %v394_v34 = vpop.permute.xlu1 %393  ;;  %v364_v39 = vpop.permute.xlu0 %363 }
  0xc2   :  { %v479_v18 = vsel %vm476_vm8, %v470_v30, %v394_v34  ;;  %v471_v45 = vsel %vm467_vm6, %v462_v43, %v364_v39  ;;  %v56_v34 = vsel %vm54_vm4, %v49_v60, %v50_v21 }
  0xc3   :  { %v488_v28 = vsel %vm485_vm9, %v479_v18, 1.0 }
  0xc4   :  { %v504_v35 = vmul.f32 %v496_v32, %v488_v28 }
  0xc5   :  { %v280_v37 = vpop.permute.xlu1 %279  ;;  %v186_v40 = vpop.permute.xlu0 %185 }
  0xc6   :  { %2500 = vmatprep.mubr.msk.f32.mxu0 %vm514_vm5, %v504_v35  ;;  %v446_v16 = vsel %vm440_vm13, %v437_v11, %v280_v37  ;;  %v420_v28 = vsel %vm413_vm10, %v56_v34, %v186_v40 }
  0xc9   :  { %v396_v29 = vpop.permute.xlu1 %395  ;;  %v310_v44 = vpop.permute.xlu0 %309 }
  0xca   :  { %v480_v0 = vsel %vm476_vm8, %v471_v45, %v396_v29  ;;  %v454_v2 = vsel %vm449_vm14, %v445_v63, %v310_v44 }
  0xcb   :  { %v489_v48 = vsel %vm485_vm9, %v480_v0, 1.0 }
  0xcc   :  { %v505_v49 = vmul.f32 %v497_v24, %v489_v48  ;;  %v501_v48 = vld [vmem:[%s4692_s1 + $0x38] sm:$0xff] }
  0xcd   :  { %v218_v50 = vpop.permute.xlu1 %217  ;;  %v188_v51 = vpop.permute.xlu0 %187 }
  0xce   :  { %2501 = vmatmul.mubr.msk.f32.gmra.mrb[2].mxu0 %vm514_vm5, %v505_v49  ;;  %v421_v25 = vsel %vm413_vm10, %v55_v31, %v188_v51  ;;  %v429_v35 = vsel %vm422_vm11, %v420_v28, %v218_v50  ;;  %v500_v50 = vld [vmem:[%s4692_s1 + $0x30] sm:$0xff]  ;;  %s2792_s1 = smov 64   ;;  %vm1170_vm10 = vcmask 138240  }
  0xd1   :  { %v334_v52 = vpop.permute.xlu1 %333  ;;  %v312_v7 = vpop.permute.xlu0 %311 }
  0xd2   :  { %v463_v23 = vsel %vm458_vm15, %v454_v2, %v334_v52  ;;  %v455_v19 = vsel %vm449_vm14, %v446_v16, %v312_v7 }
  0xd5   :  { %v250_v55 = vpop.permute.xlu1 %249  ;;  %v220_v56 = vpop.permute.xlu0 %219 }
  0xd6   :  { %v430_v36 = vsel %vm422_vm11, %v421_v25, %v220_v56  ;;  %v438_v37 = vsel %vm431_vm12, %v429_v35, %v250_v55  ;;  %vm4703_vm11 = vcmp.lt.s32.totalorder %v2877_v8, 3 }
  0xd9   :  { %v366_v57 = vpop.permute.xlu1 %365  ;;  %v336_v5 = vpop.permute.xlu0 %335 }
  0xda   :  { %v472_v53 = vsel %vm467_vm6, %v463_v23, %v366_v57  ;;  %v464_v26 = vsel %vm458_vm15, %v455_v19, %v336_v5 }
  0xdd   :  { %v282_v17 = vpop.permute.xlu1 %281  ;;  %v252_v62 = vpop.permute.xlu0 %251 }
  0xde   :  { %v439_v1 = vsel %vm431_vm12, %v430_v36, %v252_v62  ;;  %v447_v54 = vsel %vm440_vm13, %v438_v37, %v282_v17  ;;  %vm4704_vm12 = vmmov %vm4703_vm11 }
  0xe1   :  { %v398_v38 = vpop.permute.xlu1 %397  ;;  %v368_v4 = vpop.permute.xlu0 %367 }
  0xe2   :  { %v481_v10 = vsel %vm476_vm8, %v472_v53, %v398_v38  ;;  %v473_v9 = vsel %vm467_vm6, %v464_v26, %v368_v4 }
  0xe3   :  { %v490_v46 = vsel %vm485_vm9, %v481_v10, 1.0 }
  0xe4   :  { %v506_v47 = vmul.f32 %v498_v6, %v490_v46 }
  0xe5   :  { %v314_v15 = vpop.permute.xlu1 %313  ;;  %v284_v41 = vpop.permute.xlu0 %283 }
  0xe6   :  { %2503 = vmatprep.mubr.msk.f32.mxu0 %vm514_vm5, %v506_v47  ;;  %v448_v43 = vsel %vm440_vm13, %v439_v1, %v284_v41  ;;  %v456_v45 = vsel %vm449_vm14, %v447_v54, %v314_v15  ;;  %vm4705_vm13 = vmmov %vm4703_vm11 }
  0xe9   :  { %v316_v27 = vpop.permute.xlu1 %315  ;;  %v400_v20 = vpop.permute.xlu0 %399 }
  0xea   :  { %v482_v30 = vsel %vm476_vm8, %v473_v9, %v400_v20  ;;  %v457_v40 = vsel %vm449_vm14, %v448_v43, %v316_v27  ;;  %v1120_v9 = vld [vmem:[%s4694_s3 + $0x8] sm:$0xff]  ;;  %vm4706_vm14 = vmmov %vm4703_vm11 }
  0xeb   :  { %v491_v32 = vsel %vm485_vm9, %v482_v30, 1.0 }
  0xec   :  { %v507_v39 = vmul.f32 %v499_v13, %v491_v32 }
  0xed   :  { %v340_v18 = vpop.permute.xlu1 %339  ;;  %v338_v22 = vpop.permute.xlu0 %337 }
  0xee   :  { %2504 = vmatmul.mubr.msk.f32.gmra.mrb[4].mxu0 %vm514_vm5, %v507_v39  ;;  %v466_v24 = vsel %vm458_vm15, %v457_v40, %v340_v18  ;;  %v465_v29 = vsel %vm458_vm15, %v456_v45, %v338_v22  ;;  %vm4707_vm15 = vmmov %vm4703_vm11 }
  0xf1   :  { %v372_v33 = vpop.permute.xlu1 %371  ;;  %v370_v42 = vpop.permute.xlu0 %369 }
  0xf2   :  { %v475_v44 = vsel %vm467_vm6, %v466_v24, %v372_v33  ;;  %v474_v0 = vsel %vm467_vm6, %v465_v29, %v370_v42  ;;  %vm4708_vm6 = vmmov %vm4703_vm11 }
  0xf5   :  { %v404_v49 = vpop.permute.xlu1 %403  ;;  %v402_v51 = vpop.permute.xlu0 %401 }
  0xf6   :  { %v484_v52 = vsel %vm476_vm8, %v475_v44, %v404_v49  ;;  %v483_v7 = vsel %vm476_vm8, %v474_v0, %v402_v51  ;;  %vm4709_vm8 = vmmov %vm4708_vm6 }
  0xf7   :  { %v493_v55 = vsel %vm485_vm9, %v484_v52, 1.0  ;;  %v492_v56 = vsel %vm485_vm9, %v483_v7, 1.0  ;;  %vm1195_vm9 = vcmask 1040384  }
  0xf8   :  { %v509_v57 = vmul.f32 %v501_v48, %v493_v55  ;;  %v508_v5 = vmul.f32 %v500_v50, %v492_v56 }
  0xfa   :  { %2506 = vmatprep.mubr.msk.f32.mxu0 %vm514_vm5, %v508_v5 }
  0xfb   :  { %2507 = vmatmul.mubr.msk.f32.gmra.mrb[6].mxu0 %vm514_vm5, %v509_v57  ;;  %vm1048_vm5 = vcmask 130048  }
 0x181   :  { %v2499_v58 = vpop.f32.mrb[0].mxu0 }
 0x182   :  { %v657_v59 = vmul.f32 0.044715, %v2499_v58  ;;  %v609_v60 = vpop.f32.mrb[1].mxu0  ;;  %v649_v10 = vmul.f32 0.5, %v2499_v58 }
 0x183   :  { %v656_v61 = vmul.f32 0.044715, %v609_v60  ;;  %v648_v46 = vmul.f32 0.5, %v609_v60 }
 0x184   :  { %v665_v17 = vmul.f32 %v2499_v58, %v657_v59 }
 0x185   :  { %v664_v62 = vmul.f32 %v656_v61, %v609_v60 }
 0x186   :  { %v673_v63 = vmul.f32 %v2499_v58, %v665_v17 }
 0x187   :  { %v672_v2 = vmul.f32 %v664_v62, %v609_v60 }
 0x188   :  { %v681_v3 = vadd.f32 %v2499_v58, %v673_v63 }
 0x189   :  { %v680_v23 = vadd.f32 %v672_v2, %v609_v60 }
 0x18a   :  { %v689_v53 = vmul.f32 0.7978846, %v681_v3 }
 0x18b   :  { %v688_v6 = vmul.f32 0.7978846, %v680_v23 }
 0x18c   :  { %2707 = vtanh.f32 %v689_v53 }
 0x18d   :  { %2709 = vtanh.f32 %v688_v6 }
 0x196   :  { %v2708_v38 = vpop.eup %2707 }
 0x197   :  { %v2710_v4 = vpop.eup %2709  ;;  %v705_v12 = vadd.f32 1.0, %v2708_v38 }
 0x198   :  { %v704_v14 = vadd.f32 1.0, %v2710_v4 }
 0x199   :  { %v3339_v47 = vmul.f32 %v705_v12, %v649_v10 }
 0x19a   :  { %v3341_v11 = vmul.f32 %v704_v14, %v648_v46 }
 0x19b   :  { %938 = vrot.lane.b32.xlu0 %v3339_v47, %s2792_s1  ;;  %v737_v15 = vrot.slane %v3339_v47, 3  ;;  %v785_v41 = vrot.slane %v3339_v47, 1  ;;  %v817_v16 = vrot.slane %v3339_v47, 6  ;;  %v753_v27 = vrot.slane %v3339_v47, 4 }
 0x19c   :  { %936 = vrot.lane.b32.xlu1 %v3341_v11, %s2792_s1  ;;  %v736_v19 = vrot.slane %v3341_v11, 3  ;;  %v784_v21 = vrot.slane %v3341_v11, 1  ;;  %v816_v26 = vrot.slane %v3341_v11, 6  ;;  %v752_v32 = vrot.slane %v3341_v11, 4 }
 0x19d   :  { %v721_v31 = vrot.slane %v3339_v47, 2  ;;  %v720_v18 = vrot.slane %v3341_v11, 2  ;;  %v768_v28 = vrot.slane %v3341_v11, 7  ;;  %v769_v37 = vrot.slane %v3339_v47, 7 }
 0x19e   :  { %v750_v13 = vsel %vm71_vm1, %v736_v19, %v737_v15  ;;  %v798_v20 = vsel %vm122_vm3, %v784_v21, %v785_v41  ;;  %v830_v30 = vsel %vm156_vm7, %v816_v26, %v817_v16  ;;  %v766_v36 = vsel %vm88_vm0, %v752_v32, %v753_v27 }
 0x19f   :  { %842 = vrot.lane.b32.xlu0 %v750_v13, %s2793_s22  ;;  %v1111_v34 = vsel %vm1048_vm5, %v830_v30, 1.0  ;;  %v3396_v1 = vsel %vm54_vm4, %v720_v18, %v721_v31  ;;  %v800_v42 = vrot.slane %v3341_v11, 5  ;;  %v801_v54 = vrot.slane %v3339_v47, 5  ;;  %v1131_v11 = vld [vmem:[%s4694_s3 + $0x60] sm:$0xff] }
 0x1a0   :  { %968 = vrot.lane.b32.xlu1 %v798_v20, %s2794_s24  ;;  %v1136_v39 = vmul.f32 %v1120_v9, %v1111_v34  ;;  %v782_v24 = vsel %vm105_vm2, %v768_v28, %v769_v37 }
 0x1a1   :  { %v2502_v22 = vpop.f32.mrb[2].mxu0  ;;  %v814_v44 = vsel %vm4703_vm11, %v800_v42, %v801_v54  ;;  %vm1057_vm11 = vcmask 261120  }
 0x1a2   :  { %v659_v25 = vmul.f32 0.044715, %v2502_v22  ;;  %v619_v35 = vpop.f32.mrb[3].mxu0  ;;  %2365 = vmatprep.mubr.msk.f32.mxu1 %vm1170_vm10, %v1136_v39  ;;  %v651_v7 = vmul.f32 0.5, %v2502_v22 }
 0x1a3   :  { %v658_v33 = vmul.f32 0.044715, %v619_v35  ;;  %874 = vrot.lane.b32.xlu0 %v766_v36, %s2795_s25  ;;  %v650_v56 = vmul.f32 0.5, %v619_v35 }
 0x1a4   :  { %v667_v43 = vmul.f32 %v2502_v22, %v659_v25  ;;  %992 = vrot.lane.b32.xlu1 %v766_v36, %s2796_s29 }
 0x1a5   :  { %v666_v45 = vmul.f32 %v658_v33, %v619_v35 }
 0x1a6   :  { %v675_v40 = vmul.f32 %v2502_v22, %v667_v43 }
 0x1a7   :  { %v674_v29 = vmul.f32 %v666_v45, %v619_v35  ;;  %906 = vrot.lane.b32.xlu0 %v782_v24, %s2797_s0 }
 0x1a8   :  { %v683_v0 = vadd.f32 %v2502_v22, %v675_v40  ;;  %1024 = vrot.lane.b32.xlu1 %v814_v44, %s2798_s19  ;;  %v1151_v44 = vld [vmem:[%s4695_s4] sm:$0xff] }
 0x1a9   :  { %v682_v48 = vadd.f32 %v674_v29, %v619_v35 }
 0x1aa   :  { %v691_v49 = vmul.f32 0.7978846, %v683_v0  ;;  %v1152_v0 = vld [vmem:[%s4695_s4 + $0x8] sm:$0xff] }
 0x1ab   :  { %v690_v50 = vmul.f32 0.7978846, %v682_v48 }
 0x1ac   :  { %2711 = vtanh.f32 %v691_v49 }
 0x1ad   :  { %2713 = vtanh.f32 %v690_v50  ;;  %v2799_v50 = vmov 0.0|0.0  }
 0x1ae   :  { %2590 = vmatprep.subr.bf16.mxu1 %v2799_v50 }
 0x1b6   :  { %v2712_v51 = vpop.eup %2711 }
 0x1b7   :  { %v2714_v52 = vpop.eup %2713  ;;  %v707_v55 = vadd.f32 1.0, %v2712_v51  ;;  %v2591_v51 = vpack.c.bf16 %v1152_v0, %v1151_v44 }
 0x1b8   :  { %v706_v57 = vadd.f32 1.0, %v2714_v52 }
 0x1b9   :  { %v3412_v5 = vmul.f32 %v707_v55, %v651_v7  ;;  %2592 = vmatpush1.bf16.msra.mxu1 %v2591_v51 }
 0x1ba   :  { %v714_v58 = vmul.f32 %v706_v57, %v650_v56  ;;  %2593 = vmatprep.subr.bf16.mxu1 %v2799_v50  ;;  %v1153_v57 = vld [vmem:[%s4695_s4 + $0x10] sm:$0xff] }
 0x1bb   :  { %942 = vrot.lane.b32.xlu0 %v3412_v5, %s2792_s1  ;;  %v739_v59 = vrot.slane %v3412_v5, 3  ;;  %v787_v60 = vrot.slane %v3412_v5, 1  ;;  %v755_v61 = vrot.slane %v3412_v5, 4  ;;  %v771_v17 = vrot.slane %v3412_v5, 7 }
 0x1bc   :  { %940 = vrot.lane.b32.xlu1 %v714_v58, %s2792_s1  ;;  %v786_v62 = vrot.slane %v714_v58, 1  ;;  %v738_v63 = vrot.slane %v714_v58, 3  ;;  %v754_v2 = vrot.slane %v714_v58, 4  ;;  %v802_v3 = vrot.slane %v714_v58, 5 }
 0x1bd   :  { %v770_v23 = vrot.slane %v714_v58, 7  ;;  %v803_v53 = vrot.slane %v3412_v5, 5  ;;  %v722_v6 = vrot.slane %v714_v58, 2  ;;  %v723_v38 = vrot.slane %v3412_v5, 2 }
 0x1be   :  { %v797_v4 = vsel %vm122_vm3, %v785_v41, %v786_v62  ;;  %v749_v10 = vsel %vm71_vm1, %v737_v15, %v738_v63  ;;  %v765_v12 = vsel %vm88_vm0, %v753_v27, %v754_v2  ;;  %v813_v46 = vsel %vm4704_vm12, %v801_v54, %v802_v3 }
 0x1bf   :  { %970 = vrot.lane.b32.xlu0 %v797_v4, %s2794_s24  ;;  %v781_v14 = vsel %vm105_vm2, %v769_v37, %v770_v23  ;;  %v748_v41 = vsel %vm71_vm1, %v738_v63, %v739_v59  ;;  %v796_v15 = vsel %vm122_vm3, %v786_v62, %v787_v60  ;;  %v764_v9 = vsel %vm88_vm0, %v754_v2, %v755_v61 }
 0x1c0   :  { %844 = vrot.lane.b32.xlu1 %v749_v10, %s2793_s22  ;;  %v780_v27 = vsel %vm105_vm2, %v770_v23, %v771_v17  ;;  %v812_v13 = vsel %vm4705_vm13, %v802_v3, %v803_v53  ;;  %v3465_v20 = vsel %vm54_vm4, %v721_v31, %v722_v6  ;;  %v3471_v30 = vsel %vm54_vm4, %v722_v6, %v723_v38 }
 0x1c1   :  { %v2505_v34 = vpop.f32.mrb[4].mxu0  ;;  %v818_v39 = vrot.slane %v714_v58, 6  ;;  %v819_v22 = vrot.slane %v3412_v5, 6  ;;  %v1154_v58 = vld [vmem:[%s4695_s4 + $0x18] sm:$0xff]  ;;  %vm1066_vm12 = vcmask 392192   ;;  %vm1075_vm13 = vcmask 523264  }
 0x1c2   :  { %v661_v25 = vmul.f32 0.044715, %v2505_v34  ;;  %v629_v35 = vpop.f32.mrb[5].mxu0  ;;  %v2594_v63 = vpack.c.bf16 %v1154_v58, %v1153_v57  ;;  %v653_v4 = vmul.f32 0.5, %v2505_v34 }
 0x1c3   :  { %v660_v36 = vmul.f32 0.044715, %v629_v35  ;;  %994 = vrot.lane.b32.xlu0 %v765_v12, %s2796_s29  ;;  %v3479_v31 = vsel %vm156_vm7, %v817_v16, %v818_v39  ;;  %v3485_v37 = vsel %vm156_vm7, %v818_v39, %v819_v22 }
 0x1c4   :  { %v669_v33 = vmul.f32 %v2505_v34, %v661_v25  ;;  %876 = vrot.lane.b32.xlu1 %v765_v12, %s2795_s25  ;;  %2595 = vmatpush1.bf16.msra.mxu1 %v2594_v63 }
 0x1c5   :  { %v668_v54 = vmul.f32 %v660_v36, %v629_v35  ;;  %2596 = vmatprep.subr.bf16.mxu1 %v2799_v50 }
 0x1c6   :  { %v677_v43 = vmul.f32 %v2505_v34, %v669_v33  ;;  %v1157_v33 = vld [vmem:[%s4695_s4 + $0x30] sm:$0xff] }
 0x1c7   :  { %v676_v45 = vmul.f32 %v668_v54, %v629_v35  ;;  %1026 = vrot.lane.b32.xlu0 %v813_v46, %s2798_s19  ;;  %v1155_v46 = vld [vmem:[%s4695_s4 + $0x20] sm:$0xff]  ;;  %v1158_v54 = vld [vmem:[%s4695_s4 + $0x38] sm:$0xff] }
 0x1c8   :  { %v685_v40 = vadd.f32 %v2505_v34, %v677_v43  ;;  %908 = vrot.lane.b32.xlu1 %v781_v14, %s2797_s0  ;;  %v1156_v14 = vld [vmem:[%s4695_s4 + $0x28] sm:$0xff]  ;;  %v2600_v0 = vpack.c.bf16 %v1158_v54, %v1157_v33 }
 0x1c9   :  { %v684_v47 = vadd.f32 %v676_v45, %v629_v35 }
 0x1ca   :  { %v693_v16 = vmul.f32 0.7978846, %v685_v40 }
 0x1cb   :  { %v692_v24 = vmul.f32 0.7978846, %v684_v47  ;;  %846 = vrot.lane.b32.xlu0 %v748_v41, %s2793_s22  ;;  %v652_v41 = vmul.f32 0.5, %v629_v35 }
 0x1cc   :  { %2715 = vtanh.f32 %v693_v16  ;;  %972 = vrot.lane.b32.xlu1 %v796_v15, %s2794_s24 }
 0x1cd   :  { %2717 = vtanh.f32 %v692_v24 }
 0x1ce   :  { %v3492_v29 = vpop.f32.mrb[6].mxu0 }
 0x1cf   :  { %v663_v48 = vmul.f32 0.044715, %v3492_v29  ;;  %878 = vrot.lane.b32.xlu0 %v764_v9, %s2795_s25  ;;  %v3502_v49 = vpop.f32.mrb[7].mxu0 }
 0x1d0   :  { %v662_v52 = vmul.f32 0.044715, %v3502_v49  ;;  %996 = vrot.lane.b32.xlu1 %v764_v9, %s2796_s29  ;;  %v654_v5 = vmul.f32 0.5, %v3502_v49 }
 0x1d1   :  { %v671_v7 = vmul.f32 %v3492_v29, %v663_v48 }
 0x1d2   :  { %v670_v55 = vmul.f32 %v662_v52, %v3502_v49 }
 0x1d3   :  { %v679_v56 = vmul.f32 %v3492_v29, %v671_v7  ;;  %910 = vrot.lane.b32.xlu0 %v780_v27, %s2797_s0  ;;  %v2597_v27 = vpack.c.bf16 %v1156_v14, %v1155_v46  ;;  %v655_v14 = vmul.f32 0.5, %v3492_v29 }
 0x1d4   :  { %v678_v62 = vmul.f32 %v670_v55, %v3502_v49  ;;  %1028 = vrot.lane.b32.xlu1 %v812_v13, %s2798_s19  ;;  %v1160_v55 = vld [vmem:[%s4695_s4 + $0x48] sm:$0xff] }
 0x1d5   :  { %v687_v2 = vadd.f32 %v3492_v29, %v679_v56  ;;  %2598 = vmatpush1.bf16.msra.mxu1 %v2597_v27 }
 0x1d6   :  { %v2716_v3 = vpop.eup %2715  ;;  %v686_v23 = vadd.f32 %v678_v62, %v3502_v49  ;;  %2599 = vmatprep.subr.bf16.mxu1 %v2799_v50 }
 0x1d7   :  { %v2718_v6 = vpop.eup %2717  ;;  %v709_v10 = vadd.f32 1.0, %v2716_v3  ;;  %v695_v12 = vmul.f32 0.7978846, %v687_v2 }
 0x1d8   :  { %v708_v15 = vadd.f32 1.0, %v2718_v6  ;;  %v694_v9 = vmul.f32 0.7978846, %v686_v23 }
 0x1d9   :  { %v3529_v13 = vmul.f32 %v709_v10, %v653_v4  ;;  %2719 = vtanh.f32 %v695_v12  ;;  %2601 = vmatpush1.bf16.msra.mxu1 %v2600_v0  ;;  %v1162_v4 = vld [vmem:[%s4695_s4 + $0x58] sm:$0xff] }
 0x1da   :  { %v716_v34 = vmul.f32 %v708_v15, %v652_v41  ;;  %2721 = vtanh.f32 %v694_v9  ;;  %2602 = vmatprep.subr.bf16.mxu1 %v2799_v50 }
 0x1db   :  { %946 = vrot.lane.b32.xlu0 %v3529_v13, %s2792_s1  ;;  %v741_v39 = vrot.slane %v3529_v13, 3  ;;  %v789_v25 = vrot.slane %v3529_v13, 1  ;;  %v757_v36 = vrot.slane %v3529_v13, 4  ;;  %v773_v35 = vrot.slane %v3529_v13, 7 }
 0x1dc   :  { %944 = vrot.lane.b32.xlu1 %v716_v34, %s2792_s1  ;;  %v788_v43 = vrot.slane %v716_v34, 1  ;;  %v740_v45 = vrot.slane %v716_v34, 3  ;;  %v756_v40 = vrot.slane %v716_v34, 4  ;;  %v804_v47 = vrot.slane %v716_v34, 5 }
 0x1dd   :  { %v772_v16 = vrot.slane %v716_v34, 7  ;;  %v805_v24 = vrot.slane %v3529_v13, 5  ;;  %v724_v44 = vrot.slane %v716_v34, 2  ;;  %v725_v62 = vrot.slane %v3529_v13, 2 }
 0x1de   :  { %v795_v48 = vsel %vm122_vm3, %v787_v60, %v788_v43  ;;  %v747_v51 = vsel %vm71_vm1, %v739_v59, %v740_v45  ;;  %v763_v52 = vsel %vm88_vm0, %v755_v61, %v756_v40  ;;  %v811_v7 = vsel %vm4706_vm14, %v803_v53, %v804_v47  ;;  %vm4710_vm14 = vmmov %vm4708_vm6 }
 0x1df   :  { %974 = vrot.lane.b32.xlu0 %v795_v48, %s2794_s24  ;;  %v779_v60 = vsel %vm105_vm2, %v771_v17, %v772_v16  ;;  %v746_v59 = vsel %vm71_vm1, %v740_v45, %v741_v39  ;;  %v794_v61 = vsel %vm122_vm3, %v788_v43, %v789_v25  ;;  %v3579_v53 = vsel %vm88_vm0, %v756_v40, %v757_v36  ;;  %v1159_v17 = vld [vmem:[%s4695_s4 + $0x40] sm:$0xff] }
 0x1e0   :  { %848 = vrot.lane.b32.xlu1 %v747_v51, %s2793_s22  ;;  %v3592_v56 = vsel %vm105_vm2, %v772_v16, %v773_v35  ;;  %v3596_v57 = vsel %vm4707_vm15, %v804_v47, %v805_v24  ;;  %v3602_v58 = vsel %vm54_vm4, %v723_v38, %v724_v44  ;;  %v2603_v63 = vpack.c.bf16 %v1160_v55, %v1159_v17  ;;  %v1161_v38 = vld [vmem:[%s4695_s4 + $0x50] sm:$0xff]  ;;  %v1163_v47 = vld [vmem:[%s4695_s4 + $0x60] sm:$0xff]  ;;  %v1164_v16 = vld [vmem:[%s4695_s4 + $0x68] sm:$0xff] }
 0x1e1   :  { %v820_v2 = vrot.slane %v716_v34, 6  ;;  %v821_v3 = vrot.slane %v3529_v13, 6  ;;  %v3611_v23 = vsel %vm54_vm4, %v724_v44, %v725_v62  ;;  %v2606_v15 = vpack.c.bf16 %v1162_v4, %v1161_v38 }
 0x1e2   :  { %2604 = vmatpush1.bf16.msra.mxu1 %v2603_v63  ;;  %vm1084_vm15 = vcmask 654336  }
 0x1e3   :  { %v2720_v6 = vpop.eup %2719  ;;  %998 = vrot.lane.b32.xlu0 %v763_v52, %s2796_s29  ;;  %v3624_v10 = vsel %vm156_vm7, %v819_v22, %v820_v2  ;;  %v3630_v12 = vsel %vm156_vm7, %v820_v2, %v821_v3  ;;  %2605 = vmatprep.subr.bf16.mxu1 %v2799_v50 }
 0x1e4   :  { %v2722_v46 = vpop.eup %2721  ;;  %v711_v41 = vadd.f32 1.0, %v2720_v6  ;;  %880 = vrot.lane.b32.xlu1 %v763_v52, %s2795_s25 }
 0x1e5   :  { %v710_v9 = vadd.f32 1.0, %v2722_v46  ;;  %v1167_v46 = vld [vmem:[%s4695_s4 + $0x80] sm:$0xff] }
 0x1e6   :  { %v3636_v22 = vmul.f32 %v711_v41, %v655_v14  ;;  %2607 = vmatpush1.bf16.msra.mxu1 %v2606_v15  ;;  %v1168_v14 = vld [vmem:[%s4695_s4 + $0x88] sm:$0xff] }
 0x1e7   :  { %v3638_v27 = vmul.f32 %v710_v9, %v654_v5  ;;  %1030 = vrot.lane.b32.xlu0 %v811_v7, %s2798_s19  ;;  %2608 = vmatprep.subr.bf16.mxu1 %v2799_v50 }
 0x1e8   :  { %912 = vrot.lane.b32.xlu1 %v779_v60, %s2797_s0  ;;  %v743_v29 = vrot.slane %v3636_v22, 3  ;;  %v759_v34 = vrot.slane %v3636_v22, 4  ;;  %v791_v33 = vrot.slane %v3636_v22, 1  ;;  %v775_v40 = vrot.slane %v3636_v22, 7 }
 0x1e9   :  { %v790_v49 = vrot.slane %v3638_v27, 1  ;;  %v742_v54 = vrot.slane %v3638_v27, 3  ;;  %v758_v43 = vrot.slane %v3638_v27, 4  ;;  %v806_v45 = vrot.slane %v3638_v27, 5 }
 0x1ea   :  { %v774_v52 = vrot.slane %v3638_v27, 7  ;;  %v807_v60 = vrot.slane %v3636_v22, 5  ;;  %v726_v63 = vrot.slane %v3638_v27, 2  ;;  %v822_v2 = vrot.slane %v3638_v27, 6 }
 0x1eb   :  { %850 = vrot.lane.b32.xlu0 %v746_v59, %s2793_s22  ;;  %v793_v44 = vsel %vm122_vm3, %v789_v25, %v790_v49  ;;  %v745_v0 = vsel %vm71_vm1, %v741_v39, %v742_v54  ;;  %v761_v48 = vsel %vm88_vm0, %v757_v36, %v758_v43  ;;  %v809_v51 = vsel %vm4708_vm6, %v805_v24, %v806_v45  ;;  %v1165_v36 = vld [vmem:[%s4695_s4 + $0x70] sm:$0xff]  ;;  %v1166_v24 = vld [vmem:[%s4695_s4 + $0x78] sm:$0xff] }
 0x1ec   :  { %976 = vrot.lane.b32.xlu1 %v794_v61, %s2794_s24  ;;  %v744_v25 = vsel %vm71_vm1, %v742_v54, %v743_v29  ;;  %v792_v39 = vsel %vm122_vm3, %v790_v49, %v791_v33  ;;  %v760_v7 = vsel %vm88_vm0, %v758_v43, %v759_v34  ;;  %v2609_v59 = vpack.c.bf16 %v1164_v16, %v1163_v47 }
 0x1ed   :  { %v727_v61 = vrot.slane %v3636_v22, 2  ;;  %v777_v17 = vsel %vm105_vm2, %v773_v35, %v774_v52  ;;  %v776_v55 = vsel %vm105_vm2, %v774_v52, %v775_v40  ;;  %v808_v6 = vsel %vm4709_vm8, %v806_v45, %v807_v60 }
 0x1ee   :  { %2610 = vmatpush1.bf16.msra.mxu1 %v2609_v59  ;;  %v2612_v38 = vpack.c.bf16 %v1166_v24, %v1165_v36  ;;  %v823_v4 = vrot.slane %v3636_v22, 6  ;;  %v751_v13 = vsel %vm71_vm1, %v743_v29, %v736_v19  ;;  %v783_v19 = vsel %vm105_vm2, %v775_v40, %v768_v28 }
 0x1ef   :  { %882 = vrot.lane.b32.xlu0 %v3579_v53, %s2795_s25  ;;  %v3708_v35 = vsel %vm54_vm4, %v727_v61, %v720_v18  ;;  %2611 = vmatprep.subr.bf16.mxu1 %v2799_v50  ;;  %v3724_v18 = vsel %vm54_vm4, %v725_v62, %v726_v63  ;;  %v3728_v41 = vsel %vm54_vm4, %v726_v63, %v727_v61  ;;  %vm1093_vm6 = vcmask 785408  }
 0x1f0   :  { %1000 = vrot.lane.b32.xlu1 %v3579_v53, %s2796_s29  ;;  %v3734_v53 = vsel %vm156_vm7, %v821_v3, %v822_v2  ;;  %v3740_v15 = vsel %vm156_vm7, %v822_v2, %v823_v4  ;;  %v2615_v62 = vpack.c.bf16 %v1168_v14, %v1167_v46  ;;  %v767_v3 = vsel %vm88_vm0, %v759_v34, %v752_v32 }
 0x1f1   :  { %v799_v32 = vsel %vm122_vm3, %v791_v33, %v784_v21  ;;  %vm1102_vm8 = vcmask 916480  }
 0x1f2   :  { %2613 = vmatpush1.bf16.msra.mxu1 %v2612_v38 }
 0x1f3   :  { %914 = vrot.lane.b32.xlu0 %v3592_v56, %s2797_s0  ;;  %2614 = vmatprep.subr.bf16.mxu1 %v2799_v50  ;;  %v2800_v56 = vmov 0.0  }
 0x1f4   :  { %1032 = vrot.lane.b32.xlu1 %v3596_v57, %s2798_s19  ;;  %v1169_v57 = vld [vmem:[%s4695_s4 + $0x90] sm:$0x1] }
 0x1f6   :  { %2616 = vmatpush1.bf16.msra.mxu1 %v2615_v62 }
 0x1f7   :  { %840 = vrot.lane.b32.xlu0 %v751_v13, %s2793_s22  ;;  %1235 = vmatprep.subr.mxu1 %v2800_v56 }
 0x1f8   :  { %872 = vrot.lane.b32.xlu1 %v767_v3, %s2795_s25 }
 0x1fa   :  { %2364 = vmatpush1.msk.msra.mxu1 %vm1195_vm9, %v1169_v57 }
 0x1fb   :  { %904 = vrot.lane.b32.xlu0 %v783_v19, %s2797_s0 }
 0x1fc   :  { %948 = vrot.lane.b32.xlu1 %v3638_v27, %s2792_s1 }
 0x1ff   :  { %950 = vrot.lane.b32.xlu0 %v3636_v22, %s2792_s1 }
 0x200   :  { %982 = vrot.lane.b32.xlu1 %v799_v32, %s2794_s24 }
 0x203   :  { %978 = vrot.lane.b32.xlu0 %v793_v44, %s2794_s24 }
 0x204   :  { %852 = vrot.lane.b32.xlu1 %v745_v0, %s2793_s22 }
 0x207   :  { %1002 = vrot.lane.b32.xlu0 %v761_v48, %s2796_s29 }
 0x208   :  { %884 = vrot.lane.b32.xlu1 %v761_v48, %s2795_s25 }
 0x20b   :  { %1034 = vrot.lane.b32.xlu0 %v809_v51, %s2798_s19 }
 0x20c   :  { %916 = vrot.lane.b32.xlu1 %v777_v17, %s2797_s0 }
 0x20d   :  { %v939_v28 = vpop.permute.xlu0 %938 }
 0x20e   :  { %v937_v29 = vpop.permute.xlu1 %936 }
 0x20f   :  { %854 = vrot.lane.b32.xlu0 %v744_v25, %s2793_s22 }
 0x210   :  { %980 = vrot.lane.b32.xlu1 %v792_v39, %s2794_s24 }
 0x211   :  { %v843_v21 = vpop.permute.xlu0 %842 }
 0x212   :  { %v1050_v5 = vsel %vm1048_vm5, %v3396_v1, %v843_v21  ;;  %v815_v1 = vsel %vm4710_vm14, %v807_v60, %v800_v42  ;;  %v969_v54 = vpop.permute.xlu1 %968 }
 0x213   :  { %886 = vrot.lane.b32.xlu0 %v760_v7, %s2795_s25 }
 0x214   :  { %1004 = vrot.lane.b32.xlu1 %v760_v7, %s2796_s29 }
 0x215   :  { %v875_v9 = vpop.permute.xlu0 %874 }
 0x216   :  { %v1059_v27 = vsel %vm1057_vm11, %v1050_v5, %v875_v9  ;;  %v993_v43 = vpop.permute.xlu1 %992 }
 0x217   :  { %918 = vrot.lane.b32.xlu0 %v776_v55, %s2797_s0 }
 0x218   :  { %1036 = vrot.lane.b32.xlu1 %v808_v6, %s2798_s19 }
 0x219   :  { %v907_v34 = vpop.permute.xlu0 %906 }
 0x21a   :  { %v1068_v33 = vsel %vm1066_vm12, %v1059_v27, %v907_v34  ;;  %v1025_v45 = vpop.permute.xlu1 %1024 }
 0x21b   :  { %1006 = vrot.lane.b32.xlu0 %v767_v3, %s2796_s29  ;;  %v1077_v49 = vsel %vm1075_vm13, %v1068_v33, %v939_v28 }
 0x21c   :  { %1038 = vrot.lane.b32.xlu1 %v815_v1, %s2798_s19 }
 0x22d   :  { %v943_v40 = vpop.permute.xlu0 %942 }
 0x22e   :  { %v941_v47 = vpop.permute.xlu1 %940 }
 0x231   :  { %v971_v16 = vpop.permute.xlu0 %970 }
 0x232   :  { %v845_v44 = vpop.permute.xlu1 %844 }
 0x233   :  { %v1051_v51 = vsel %vm1048_vm5, %v3465_v20, %v845_v44 }
 0x235   :  { %v995_v0 = vpop.permute.xlu0 %994 }
 0x236   :  { %v877_v48 = vpop.permute.xlu1 %876 }
 0x237   :  { %v1060_v25 = vsel %vm1057_vm11, %v1051_v51, %v877_v48  ;;  %v1119_v51 = vld [vmem:[%s4694_s3] sm:$0xff] }
 0x239   :  { %v1027_v52 = vpop.permute.xlu0 %1026 }
 0x23a   :  { %v909_v42 = vpop.permute.xlu1 %908 }
 0x23b   :  { %v1069_v39 = vsel %vm1066_vm12, %v1060_v25, %v909_v42  ;;  %v1112_v42 = vsel %vm1048_vm5, %v3479_v31, 1.0 }
 0x23c   :  { %v1078_v7 = vsel %vm1075_vm13, %v1069_v39, %v941_v47  ;;  %v1122_v39 = vld [vmem:[%s4694_s3 + $0x18] sm:$0xff] }
 0x23d   :  { %v847_v36 = vpop.permute.xlu0 %846  ;;  %v1138_v31 = vmul.f32 %v1122_v39, %v1112_v42  ;;  %v1116_v39 = vsel %vm1048_vm5, %v3734_v53, 1.0  ;;  %v1129_v53 = vld [vmem:[%s4694_s3 + $0x50] sm:$0xff] }
 0x23e   :  { %v973_v24 = vpop.permute.xlu1 %972  ;;  %v1052_v59 = vsel %vm1048_vm5, %v3471_v30, %v847_v36 }
 0x241   :  { %v879_v60 = vpop.permute.xlu0 %878 }
 0x242   :  { %v997_v61 = vpop.permute.xlu1 %996  ;;  %v1061_v17 = vsel %vm1057_vm11, %v1052_v59, %v879_v60 }
 0x245   :  { %v911_v55 = vpop.permute.xlu0 %910 }
 0x246   :  { %v1070_v20 = vsel %vm1066_vm12, %v1061_v17, %v911_v55  ;;  %v1029_v2 = vpop.permute.xlu1 %1028 }
 0x247   :  { %v1079_v63 = vsel %vm1075_vm13, %v1070_v20, %v943_v40  ;;  %v1113_v20 = vsel %vm1048_vm5, %v3485_v37, 1.0 }
 0x24d   :  { %v3813_v6 = vpop.permute.xlu0 %946 }
 0x24e   :  { %v3815_v38 = vpop.permute.xlu1 %944 }
 0x251   :  { %v975_v46 = vpop.permute.xlu0 %974 }
 0x252   :  { %v849_v14 = vpop.permute.xlu1 %848 }
 0x253   :  { %v1053_v37 = vsel %vm1048_vm5, %v3602_v58, %v849_v14 }
 0x255   :  { %v999_v62 = vpop.permute.xlu0 %998 }
 0x256   :  { %v881_v13 = vpop.permute.xlu1 %880 }
 0x259   :  { %v1031_v3 = vpop.permute.xlu0 %1030 }
 0x25a   :  { %v913_v57 = vpop.permute.xlu1 %912 }
 0x25d   :  { %v851_v30 = vpop.permute.xlu0 %850 }
 0x25e   :  { %v3817_v19 = vpop.permute.xlu1 %976 }
 0x261   :  { %v883_v32 = vpop.permute.xlu0 %882 }
 0x262   :  { %v3819_v28 = vpop.permute.xlu1 %1000 }
 0x265   :  { %v3821_v21 = vpop.permute.xlu0 %914 }
 0x266   :  { %v3823_v5 = vpop.permute.xlu1 %1032 }
 0x269   :  { %v841_v9 = vpop.permute.xlu0 %840 }
 0x26a   :  { %v1049_v27 = vsel %vm1048_vm5, %v3708_v35, %v841_v9  ;;  %v873_v34 = vpop.permute.xlu1 %872 }
 0x26b   :  { %v1058_v33 = vsel %vm1057_vm11, %v1049_v27, %v873_v34 }
 0x26d   :  { %v905_v1 = vpop.permute.xlu0 %904 }
 0x26e   :  { %v1067_v40 = vsel %vm1066_vm12, %v1058_v33, %v905_v1  ;;  %v3829_v47 = vpop.permute.xlu1 %948  ;;  %v1062_v33 = vsel %vm1057_vm11, %v1053_v37, %v881_v13  ;;  %v1088_v1 = vsel %vm1084_vm15, %v1079_v63, %v975_v46  ;;  %v1125_v13 = vld [vmem:[%s4694_s3 + $0x30] sm:$0xff] }
 0x26f   :  { %v1076_v44 = vsel %vm1075_vm13, %v1067_v40, %v937_v29  ;;  %v1086_v29 = vsel %vm1084_vm15, %v1077_v49, %v971_v16  ;;  %v1124_v49 = vld [vmem:[%s4694_s3 + $0x28] sm:$0xff]  ;;  %v1071_v40 = vsel %vm1066_vm12, %v1062_v33, %v913_v57  ;;  %v1097_v14 = vsel %vm1093_vm6, %v1088_v1, %v999_v62  ;;  %v1133_v1 = vld [vmem:[%s4694_s3 + $0x70] sm:$0xff] }
 0x270   :  { %v1085_v48 = vsel %vm1084_vm15, %v1076_v44, %v969_v54  ;;  %v1095_v60 = vsel %vm1093_vm6, %v1086_v29, %v995_v0  ;;  %v1140_v34 = vmul.f32 %v1124_v49, %v1113_v20  ;;  %v1054_v44 = vsel %vm1048_vm5, %v3611_v23, %v851_v30 }
 0x271   :  { %v3836_v35 = vpop.permute.xlu0 %950  ;;  %v1094_v25 = vsel %vm1093_vm6, %v1085_v48, %v993_v43  ;;  %v1121_v43 = vld [vmem:[%s4694_s3 + $0x10] sm:$0xff]  ;;  %v1104_v17 = vsel %vm1102_vm8, %v1095_v60, %v1027_v52  ;;  %v1123_v52 = vld [vmem:[%s4694_s3 + $0x20] sm:$0xff]  ;;  %v1080_v63 = vsel %vm1075_vm13, %v1071_v40, %v3815_v38  ;;  %v1063_v46 = vsel %vm1057_vm11, %v1054_v44, %v883_v32 }
 0x272   :  { %v3845_v36 = vpop.permute.xlu1 %982  ;;  %v1103_v54 = vsel %vm1102_vm8, %v1094_v25, %v1025_v45  ;;  %v1087_v45 = vsel %vm1084_vm15, %v1078_v7, %v973_v24  ;;  %v1137_v0 = vmul.f32 %v1121_v43, %v1104_v17  ;;  %v1114_v24 = vsel %vm1048_vm5, %v3624_v10, 1.0  ;;  %v1786_v44 = vld [vmem:[%s4697_s6 + $0x110] sm:$0xff] }
 0x273   :  { %v1135_v59 = vmul.f32 %v1119_v51, %v1103_v54  ;;  %v1096_v9 = vsel %vm1093_vm6, %v1087_v45, %v997_v61  ;;  %v1126_v61 = vld [vmem:[%s4694_s3 + $0x38] sm:$0xff]  ;;  %v1106_v10 = vsel %vm1102_vm8, %v1097_v14, %v1031_v3  ;;  %v1115_v62 = vsel %vm1048_vm5, %v3630_v12, 1.0  ;;  %v1128_v51 = vld [vmem:[%s4694_s3 + $0x48] sm:$0xff]  ;;  %v1127_v12 = vld [vmem:[%s4694_s3 + $0x40] sm:$0xff] }
 0x274   :  { %v1105_v27 = vsel %vm1102_vm8, %v1096_v9, %v1029_v2  ;;  %v1142_v48 = vmul.f32 %v1126_v61, %v1114_v24  ;;  %v1089_v3 = vsel %vm1084_vm15, %v1080_v63, %v3817_v19  ;;  %v1072_v23 = vsel %vm1066_vm12, %v1063_v46, %v3821_v21  ;;  %v1788_v46 = vld [vmem:[%s4697_s6 + $0x120] sm:$0x1] }
 0x275   :  { %1264 = vmatmul.mubr.f32.vlgmr.msra.gmra.mrb[0].mxu1 %v1135_v59  ;;  %v979_v55 = vpop.permute.xlu0 %978  ;;  %v1139_v58 = vmul.f32 %v1123_v52, %v1105_v27  ;;  %v1141_v30 = vmul.f32 %v1125_v13, %v1106_v10  ;;  %v1098_v32 = vsel %vm1093_vm6, %v1089_v3, %v3819_v28  ;;  %v1144_v42 = vmul.f32 %v1128_v51, %v1115_v62  ;;  %v1130_v28 = vld [vmem:[%s4694_s3 + $0x58] sm:$0xff]  ;;  %v1785_v13 = vld [vmem:[%s4697_s6 + $0x108] sm:$0xff] }
 0x276   :  { %2366 = vmatprep.mubr.msk.f32.mxu1 %vm1170_vm10, %v1138_v31  ;;  %v853_v16 = vpop.permute.xlu1 %852  ;;  %v1107_v25 = vsel %vm1102_vm8, %v1098_v32, %v3823_v5  ;;  %v1081_v19 = vsel %vm1075_vm13, %v1072_v23, %v3813_v6  ;;  %v1146_v17 = vmul.f32 %v1130_v28, %v1116_v39  ;;  %v1117_v20 = vsel %vm1048_vm5, %v3740_v15, 1.0 }
 0x277   :  { %v1090_v29 = vsel %vm1084_vm15, %v1081_v19, %v979_v55  ;;  %v1143_v60 = vmul.f32 %v1127_v12, %v1107_v25  ;;  %v1055_v5 = vsel %vm1048_vm5, %v3724_v18, %v853_v16  ;;  %v1132_v18 = vld [vmem:[%s4694_s3 + $0x68] sm:$0xff]  ;;  %v831_v16 = vsel %vm156_vm7, %v823_v4, %v816_v26 }
 0x278   :  { %v1148_v9 = vmul.f32 %v1132_v18, %v1117_v20 }
 0x279   :  { %1269 = vmatmul.mubr.f32.gmra.mrb[2].mxu1 %v1137_v0  ;;  %v1003_v7 = vpop.permute.xlu0 %1002 }
 0x27a   :  { %2367 = vmatprep.mubr.msk.f32.mxu1 %vm1170_vm10, %v1140_v34  ;;  %v885_v2 = vpop.permute.xlu1 %884  ;;  %v1099_v6 = vsel %vm1093_vm6, %v1090_v29, %v1003_v7 }
 0x27b   :  { %v1064_v59 = vsel %vm1057_vm11, %v1055_v5, %v885_v2 }
 0x27d   :  { %1274 = vmatmul.mubr.f32.gmra.mrb[4].mxu1 %v1139_v58  ;;  %v1035_v57 = vpop.permute.xlu0 %1034 }
 0x27e   :  { %2368 = vmatprep.mubr.msk.f32.mxu1 %vm1170_vm10, %v1142_v48  ;;  %v917_v38 = vpop.permute.xlu1 %916  ;;  %v1108_v43 = vsel %vm1102_vm8, %v1099_v6, %v1035_v57  ;;  %v1787_v48 = vld [vmem:[%s4697_s6 + $0x118] sm:$0xff] }
 0x27f   :  { %v1073_v31 = vsel %vm1066_vm12, %v1064_v59, %v917_v38  ;;  %v1145_v45 = vmul.f32 %v1129_v53, %v1108_v43  ;;  %v2653_v63 = vpack.c.bf16 %v1787_v48, %v1786_v44 }
 0x280   :  { %v1082_v15 = vsel %vm1075_vm13, %v1073_v31, %v3829_v47  ;;  %v1134_v47 = vld [vmem:[%s4694_s3 + $0x78] sm:$0xff] }
 0x281   :  { %1279 = vmatmul.mubr.f32.gmra.mrb[6].mxu1 %v1141_v30  ;;  %v855_v21 = vpop.permute.xlu0 %854 }
 0x282   :  { %2369 = vmatprep.mubr.msk.f32.mxu1 %vm1170_vm10, %v1144_v42  ;;  %v981_v54 = vpop.permute.xlu1 %980  ;;  %v1056_v0 = vsel %vm1048_vm5, %v3728_v41, %v855_v21  ;;  %v1118_v41 = vsel %vm1048_vm5, %v831_v16, 1.0  ;;  %vm1789_vm5 = vcmask 269312  }
 0x283   :  { %v1091_v52 = vsel %vm1084_vm15, %v1082_v15, %v981_v54  ;;  %v1150_v40 = vmul.f32 %v1134_v47, %v1118_v41 }
 0x285   :  { %1284 = vmatmul.mubr.f32.gmra.mrb[8].mxu1 %v1143_v60  ;;  %v887_v55 = vpop.permute.xlu0 %886 }
 0x286   :  { %2370 = vmatprep.mubr.msk.f32.mxu1 %vm1170_vm10, %v1146_v17  ;;  %v1005_v49 = vpop.permute.xlu1 %1004  ;;  %v1065_v27 = vsel %vm1057_vm11, %v1056_v0, %v887_v55 }
 0x287   :  { %v1100_v22 = vsel %vm1093_vm6, %v1091_v52, %v1005_v49 }
 0x289   :  { %1289 = vmatmul.mubr.f32.gmra.mrb[10].mxu1 %v1145_v45  ;;  %v919_v37 = vpop.permute.xlu0 %918 }
 0x28a   :  { %v1074_v26 = vsel %vm1066_vm12, %v1065_v27, %v919_v37  ;;  %2371 = vmatprep.mubr.msk.f32.mxu1 %vm1170_vm10, %v1148_v9  ;;  %v1037_v4 = vpop.permute.xlu1 %1036 }
 0x28b   :  { %v1083_v34 = vsel %vm1075_vm13, %v1074_v26, %v3836_v35  ;;  %v1109_v33 = vsel %vm1102_vm8, %v1100_v22, %v1037_v4 }
 0x28c   :  { %v1147_v7 = vmul.f32 %v1131_v11, %v1109_v33  ;;  %v1092_v24 = vsel %vm1084_vm15, %v1083_v34, %v3845_v36  ;;  %v1784_v36 = vld [vmem:[%s4697_s6 + $0x100] sm:$0xff] }
 0x28d   :  { %v1007_v61 = vpop.permute.xlu0 %1006  ;;  %v2649_v10 = vpack.c.bf16 %v1785_v13, %v1784_v36 }
 0x28e   :  { %v1101_v2 = vsel %vm1093_vm6, %v1092_v24, %v1007_v61  ;;  %v1039_v58 = vpop.permute.xlu1 %1038  ;;  %1294 = vmatmul.mubr.f32.gmra.mrb[12].mxu1 %v1147_v7 }
 0x28f   :  { %v1110_v14 = vsel %vm1102_vm8, %v1101_v2, %v1039_v58  ;;  %2372 = vmatprep.mubr.msk.f32.mxu1 %vm1170_vm10, %v1150_v40  ;;  %2650 = vmatprep.subr.bf16.mxu1 %v2649_v10  ;;  %vm4711_vm10 = vmmov %vm4710_vm14 }
 0x290   :  { %v1149_v35 = vmul.f32 %v1133_v1, %v1110_v14  ;;  %2652 = vmatpush3.bf16.msra.mxu1 %v2649_v10 }
 0x291   :  { %2654 = vmatprep.subr.bf16.mxu1 %v2653_v63 }
 0x292   :  { %1299 = vmatmul.mubr.f32.gmra.mrb[14].mxu1 %v1149_v35 }
 0x294   :  { %2656 = vmatpush3.bf16.msra.mxu1 %v2653_v63 }
 0x295   :  { %2517 = vmatprep.subr.msk.mxu1 %vm1195_vm9, %v1788_v46 }
 0x298   :  { %2518 = vmatpush3.msk.msra.mxu1 %vm1195_vm9, %v1788_v46  ;;  %vm4712_vm9 = vmmov %vm4711_vm10 }
 0x299   :  { %2669 = vmatprep.subr.bf16.mxu1 %v2799_v50  ;;  %vm4713_vm12 = vmmov %vm4712_vm9 }
 0x348   :  { %v1265_v57 = vpop.f32.mrb[0].mxu1 }
 0x349   :  { %v1312_v62 = vmul.f32 0.044715, %v1265_v57  ;;  %v1267_v51 = vpop.f32.mrb[1].mxu1  ;;  %v1304_v22 = vmul.f32 0.5, %v1265_v57 }
 0x34b   :  { %v1320_v3 = vmul.f32 %v1312_v62, %v1265_v57 }
 0x34c   :  { %v1270_v23 = vpop.f32.mrb[2].mxu1 }
 0x34d   :  { %v1328_v38 = vmul.f32 %v1320_v3, %v1265_v57  ;;  %v1313_v30 = vmul.f32 0.044715, %v1270_v23  ;;  %v1272_v32 = vpop.f32.mrb[3].mxu1  ;;  %v1305_v24 = vmul.f32 0.5, %v1270_v23 }
 0x34f   :  { %v1336_v12 = vadd.f32 %v1328_v38, %v1265_v57  ;;  %v1321_v25 = vmul.f32 %v1313_v30, %v1270_v23 }
 0x350   :  { %v1275_v42 = vpop.f32.mrb[4].mxu1 }
 0x351   :  { %v1344_v19 = vmul.f32 0.7978846, %v1336_v12  ;;  %v1329_v21 = vmul.f32 %v1321_v25, %v1270_v23  ;;  %v1314_v39 = vmul.f32 0.044715, %v1275_v42  ;;  %v1277_v28 = vpop.f32.mrb[5].mxu1  ;;  %v1306_v14 = vmul.f32 0.5, %v1275_v42 }
 0x353   :  { %2723 = vtanh.f32 %v1344_v19  ;;  %v1337_v29 = vadd.f32 %v1329_v21, %v1270_v23  ;;  %v1322_v54 = vmul.f32 %v1314_v39, %v1275_v42 }
 0x354   :  { %v1280_v60 = vpop.f32.mrb[6].mxu1 }
 0x355   :  { %v1345_v5 = vmul.f32 0.7978846, %v1337_v29  ;;  %v1330_v6 = vmul.f32 %v1322_v54, %v1275_v42  ;;  %v1315_v59 = vmul.f32 0.044715, %v1280_v60  ;;  %v1282_v53 = vpop.f32.mrb[7].mxu1  ;;  %v1307_v13 = vmul.f32 0.5, %v1280_v60 }
 0x357   :  { %2725 = vtanh.f32 %v1345_v5  ;;  %v1338_v43 = vadd.f32 %v1330_v6, %v1275_v42  ;;  %v1323_v17 = vmul.f32 %v1315_v59, %v1280_v60  ;;  %v1706_v59 = vld [vmem:[%s4696_s5 + $0x10] sm:$0xff] }
 0x358   :  { %v3978_v31 = vpop.f32.mrb[8].mxu1 }
 0x359   :  { %v1346_v55 = vmul.f32 0.7978846, %v1338_v43  ;;  %v1331_v20 = vmul.f32 %v1323_v17, %v1280_v60  ;;  %v1316_v18 = vmul.f32 0.044715, %v3978_v31  ;;  %v1287_v49 = vpop.f32.mrb[9].mxu1 }
 0x35b   :  { %2727 = vtanh.f32 %v1346_v55  ;;  %v1339_v45 = vadd.f32 %v1331_v20, %v1280_v60  ;;  %v1324_v16 = vmul.f32 %v1316_v18, %v3978_v31  ;;  %v1709_v20 = vld [vmem:[%s4696_s5 + $0x28] sm:$0xff] }
 0x35c   :  { %v3982_v0 = vpop.f32.mrb[10].mxu1 }
 0x35d   :  { %v2724_v15 = vpop.eup %2723  ;;  %v1347_v9 = vmul.f32 0.7978846, %v1339_v45  ;;  %v1332_v52 = vmul.f32 %v1324_v16, %v3978_v31  ;;  %v1317_v27 = vmul.f32 0.044715, %v3982_v0  ;;  %v1292_v37 = vpop.f32.mrb[11].mxu1 }
 0x35e   :  { %v1360_v11 = vadd.f32 1.0, %v2724_v15  ;;  %v1308_v37 = vmul.f32 0.5, %v3978_v31 }
 0x35f   :  { %2729 = vtanh.f32 %v1347_v9  ;;  %v1340_v26 = vadd.f32 %v1332_v52, %v3978_v31  ;;  %v1325_v4 = vmul.f32 %v1317_v27, %v3982_v0  ;;  %v1712_v31 = vld [vmem:[%s4696_s5 + $0x40] sm:$0xff] }
 0x360   :  { %v3988_v47 = vmul.f32 %v1360_v11, %v1304_v22 }
 0x361   :  { %v2726_v41 = vpop.eup %2725  ;;  %v1348_v34 = vmul.f32 0.7978846, %v1340_v26  ;;  %v1333_v33 = vmul.f32 %v1325_v4, %v3982_v0  ;;  %v3991_v7 = vpop.f32.mrb[12].mxu1 }
 0x362   :  { %v1361_v61 = vadd.f32 1.0, %v2726_v41  ;;  %v1318_v1 = vmul.f32 0.044715, %v3991_v7  ;;  %v1297_v40 = vpop.f32.mrb[13].mxu1  ;;  %v1392_v48 = vrot.slane %v3988_v47, 3  ;;  %v1440_v63 = vrot.slane %v3988_v47, 1 }
 0x363   :  { %2731 = vtanh.f32 %v1348_v34  ;;  %v1341_v2 = vadd.f32 %v1333_v33, %v3982_v0  ;;  %v1472_v3 = vrot.slane %v3988_v47, 6  ;;  %v1408_v42 = vrot.slane %v3988_v47, 4 }
 0x364   :  { %v3995_v58 = vmul.f32 %v1361_v61, %v1305_v24  ;;  %v1326_v35 = vmul.f32 %v1318_v1, %v3991_v7  ;;  %v1456_v41 = vrot.slane %v3988_v47, 5 }
 0x365   :  { %v2728_v36 = vpop.eup %2727  ;;  %v1349_v10 = vmul.f32 0.7978846, %v1341_v2  ;;  %v3998_v44 = vpop.f32.mrb[14].mxu1 }
 0x366   :  { %v1362_v46 = vadd.f32 1.0, %v2728_v36  ;;  %v1334_v57 = vmul.f32 %v1326_v35, %v3991_v7  ;;  %v1319_v62 = vmul.f32 0.044715, %v3998_v44  ;;  %v1302_v51 = vpop.f32.mrb[15].mxu1  ;;  %v1393_v23 = vrot.slane %v3995_v58, 3 }
 0x367   :  { %2733 = vtanh.f32 %v1349_v10  ;;  %v1441_v38 = vrot.slane %v3995_v58, 1  ;;  %v1473_v30 = vrot.slane %v3995_v58, 6  ;;  %v1409_v29 = vrot.slane %v3995_v58, 4 }
 0x368   :  { %v4008_v32 = vmul.f32 %v1362_v46, %v1306_v14  ;;  %v1342_v12 = vadd.f32 %v1334_v57, %v3991_v7  ;;  %v1327_v25 = vmul.f32 %v1319_v62, %v3998_v44  ;;  %v1406_v21 = vsel %vm71_vm1, %v1392_v48, %v1393_v23  ;;  %v1715_v62 = vld [vmem:[%s4696_s5 + $0x58] sm:$0xff] }
 0x369   :  { %v2730_v19 = vpop.eup %2729  ;;  %v1454_v39 = vsel %vm122_vm3, %v1440_v63, %v1441_v38  ;;  %v1486_v28 = vsel %vm156_vm7, %v1472_v3, %v1473_v30  ;;  %1498 = vrot.lane.b32.xlu1 %v1406_v21, %s2795_s25  ;;  %v1457_v43 = vrot.slane %v3995_v58, 5  ;;  %v1422_v55 = vsel %vm88_vm0, %v1408_v42, %v1409_v29 }
 0x36a   :  { %v1363_v54 = vadd.f32 1.0, %v2730_v19  ;;  %v1350_v60 = vmul.f32 0.7978846, %v1342_v12  ;;  %v1335_v5 = vmul.f32 %v1327_v25, %v3998_v44  ;;  %1592 = vrot.lane.b32.xlu0 %v1454_v39, %s2795_s25  ;;  %v1474_v6 = vrot.slane %v4008_v32, 6 }
 0x36b   :  { %v1696_v53 = vsel %vm1057_vm11, %v1486_v28, 1.0  ;;  %v1458_v17 = vrot.slane %v4008_v32, 5  ;;  %v1426_v27 = vrot.slane %v4008_v32, 7  ;;  %v1425_v4 = vrot.slane %v3995_v58, 7 }
 0x36c   :  { %v4049_v18 = vmul.f32 %v1363_v54, %v1307_v13  ;;  %2735 = vtanh.f32 %v1350_v60  ;;  %v1343_v49 = vadd.f32 %v1335_v5, %v3998_v44  ;;  %v1485_v45 = vsel %vm156_vm7, %v1473_v30, %v1474_v6 }
 0x36d   :  { %v2732_v16 = vpop.eup %2731  ;;  %v1730_v15 = vmul.f32 %v1706_v59, %v1696_v53  ;;  %v1469_v9 = vsel %vm4711_vm10, %v1457_v43, %v1458_v17  ;;  %v1697_v52 = vsel %vm1057_vm11, %v1485_v45, 1.0  ;;  %v1437_v61 = vsel %vm105_vm2, %v1425_v4, %v1426_v27 }
 0x36e   :  { %v1364_v11 = vadd.f32 1.0, %v2732_v16  ;;  %v1351_v22 = vmul.f32 0.7978846, %v1343_v49  ;;  %1626 = vrot.lane.b32.xlu1 %v1469_v9, %s2796_s29  ;;  %1530 = vrot.lane.b32.xlu0 %v1422_v55, %s2792_s1  ;;  %v1733_v26 = vmul.f32 %v1709_v20, %v1697_v52  ;;  %v1475_v34 = vrot.slane %v4049_v18, 6 }
 0x36f   :  { %2519 = vmatprep.mubr.msk.f32.mxu1 %vm1789_vm5, %v1730_v15  ;;  %v1470_v1 = vsel %vm4712_vm9, %v1456_v41, %v1457_v43  ;;  %v1443_v2 = vrot.slane %v4049_v18, 1  ;;  %v1309_v14 = vmul.f32 0.5, %v3982_v0  ;;  %v1442_v46 = vrot.slane %v4008_v32, 1 }
 0x370   :  { %v4067_v33 = vmul.f32 %v1364_v11, %v1308_v37  ;;  %2737 = vtanh.f32 %v1351_v22  ;;  %2520 = vmatmul.mubr.msk.f32.vlgmr.msra.gmra.mrb[16].mxu1 %vm1789_vm5, %v1733_v26  ;;  %v1484_v40 = vsel %vm156_vm7, %v1474_v6, %v1475_v34  ;;  %v1424_v57 = vrot.slane %v3988_v47, 7  ;;  %v1718_v6 = vld [vmem:[%s4696_s5 + $0x70] sm:$0xff]  ;;  %v1721_v37 = vld [vmem:[%s4696_s5 + $0x88] sm:$0xff] }
 0x371   :  { %v2734_v24 = vpop.eup %2733  ;;  %v1698_v36 = vsel %vm1057_vm11, %v1484_v40, 1.0  ;;  %v1452_v30 = vsel %vm122_vm3, %v1442_v46, %v1443_v2  ;;  %v1411_v19 = vrot.slane %v4049_v18, 4  ;;  %v1310_v54 = vmul.f32 0.5, %v3991_v7 }
 0x372   :  { %v1365_v35 = vadd.f32 1.0, %v2734_v24  ;;  %1564 = vrot.lane.b32.xlu1 %v1437_v61, %s2796_s29  ;;  %1624 = vrot.lane.b32.xlu0 %v1470_v1, %s2796_s29  ;;  %v1476_v13 = vrot.slane %v4067_v33, 6  ;;  %v1736_v10 = vmul.f32 %v1712_v31, %v1698_v36  ;;  %v1438_v12 = vsel %vm105_vm2, %v1424_v57, %v1425_v4  ;;  %v1724_v61 = vld [vmem:[%s4696_s5 + $0xa0] sm:$0xff]  ;;  %v1727_v1 = vld [vmem:[%s4696_s5 + $0xb8] sm:$0xff] }
 0x373   :  { %v1410_v5 = vrot.slane %v4008_v32, 4  ;;  %v1453_v59 = vsel %vm122_vm3, %v1441_v38, %v1442_v46  ;;  %v1395_v20 = vrot.slane %v4049_v18, 3  ;;  %v1311_v45 = vmul.f32 0.5, %v3998_v44  ;;  %v1769_v46 = vld [vmem:[%s4697_s6 + $0x88] sm:$0xff] }
 0x374   :  { %v4094_v51 = vmul.f32 %v1365_v35, %v1309_v14  ;;  %v1483_v0 = vsel %vm156_vm7, %v1475_v34, %v1476_v13  ;;  %2522 = vmatprep.mubr.msk.f32.mxu1 %vm1789_vm5, %v1736_v10  ;;  %v1394_v15 = vrot.slane %v4008_v32, 3  ;;  %v1460_v22 = vrot.slane %v4067_v33, 5  ;;  %v1768_v10 = vld [vmem:[%s4697_s6 + $0x80] sm:$0xff] }
 0x375   :  { %v1699_v25 = vsel %vm1057_vm11, %v1483_v0, 1.0  ;;  %v1420_v7 = vsel %vm88_vm0, %v1410_v5, %v1411_v19  ;;  %v1421_v52 = vsel %vm88_vm0, %v1409_v29, %v1410_v5  ;;  %v1459_v4 = vrot.slane %v4049_v18, 5  ;;  %v1755_v5 = vld [vmem:[%s4697_s6 + $0x18] sm:$0xff] }
 0x376   :  { %v2736_v21 = vpop.eup %2735  ;;  %1596 = vrot.lane.b32.xlu1 %v1452_v30, %s2795_s25  ;;  %1562 = vrot.lane.b32.xlu0 %v1438_v12, %s2796_s29  ;;  %v1739_v39 = vmul.f32 %v1715_v62, %v1699_v25  ;;  %v1477_v28 = vrot.slane %v4094_v51, 6  ;;  %v1404_v44 = vsel %vm71_vm1, %v1394_v15, %v1395_v20  ;;  %v1405_v24 = vsel %vm71_vm1, %v1393_v23, %v1394_v15  ;;  %v1752_v30 = vld [vmem:[%s4697_s6] sm:$0xff]  ;;  %v1753_v12 = vld [vmem:[%s4697_s6 + $0x8] sm:$0xff] }
 0x377   :  { %v1366_v60 = vadd.f32 1.0, %v2736_v21  ;;  %v1467_v40 = vsel %vm4713_vm12, %v1459_v4, %v1460_v22  ;;  %v1428_v14 = vrot.slane %v4067_v33, 7  ;;  %v1427_v62 = vrot.slane %v4049_v18, 7  ;;  %v1756_v15 = vld [vmem:[%s4697_s6 + $0x20] sm:$0xff] }
 0x378   :  { %2523 = vmatmul.mubr.msk.f32.gmra.mrb[18].mxu1 %vm1789_vm5, %v1739_v39  ;;  %v1482_v53 = vsel %vm156_vm7, %v1476_v13, %v1477_v28  ;;  %v1445_v39 = vrot.slane %v4094_v51, 1 }
 0x379   :  { %v4124_v43 = vmul.f32 %v1366_v60, %v1310_v54  ;;  %v1700_v55 = vsel %vm1057_vm11, %v1482_v53, 1.0  ;;  %v1435_v25 = vsel %vm105_vm2, %v1427_v62, %v1428_v14  ;;  %v1770_v54 = vld [vmem:[%s4697_s6 + $0x90] sm:$0xff]  ;;  %v1771_v60 = vld [vmem:[%s4697_s6 + $0x98] sm:$0xff] }
 0x37a   :  { %v2738_v49 = vpop.eup %2737  ;;  %1534 = vrot.lane.b32.xlu1 %v1420_v7, %s2792_s1  ;;  %1594 = vrot.lane.b32.xlu0 %v1453_v59, %s2795_s25  ;;  %v1742_v38 = vmul.f32 %v1718_v6, %v1700_v55  ;;  %v1444_v6 = vrot.slane %v4067_v33, 1  ;;  %v2619_v59 = vpack.c.bf16 %v1753_v12, %v1752_v30  ;;  %v2621_v53 = vpack.c.bf16 %v1771_v60, %v1770_v54  ;;  %v1772_v7 = vld [vmem:[%s4697_s6 + $0xa0] sm:$0xff]  ;;  %v1773_v55 = vld [vmem:[%s4697_s6 + $0xa8] sm:$0xff] }
 0x37b   :  { %v1367_v16 = vadd.f32 1.0, %v2738_v49  ;;  %v1478_v9 = vrot.slane %v4124_v43, 6  ;;  %v1780_v54 = vld [vmem:[%s4697_s6 + $0xe0] sm:$0xff]  ;;  %v1781_v60 = vld [vmem:[%s4697_s6 + $0xe8] sm:$0xff] }
 0x37c   :  { %2525 = vmatprep.mubr.msk.f32.mxu1 %vm1789_vm5, %v1742_v38  ;;  %v1450_v49 = vsel %vm122_vm3, %v1444_v6, %v1445_v39  ;;  %v1436_v38 = vsel %vm105_vm2, %v1426_v27, %v1427_v62  ;;  %v2625_v27 = vpack.c.bf16 %v1773_v55, %v1772_v7  ;;  %v1778_v62 = vld [vmem:[%s4697_s6 + $0xd0] sm:$0xff]  ;;  %v2641_v7 = vpack.c.bf16 %v1781_v60, %v1780_v54 }
 0x37d   :  { %v4145_v11 = vmul.f32 %v1367_v16, %v1311_v45  ;;  %v1481_v26 = vsel %vm156_vm7, %v1477_v28, %v1478_v9  ;;  %v2617_v28 = vpack.c.bf16 %v1769_v46, %v1768_v10  ;;  %v1413_v45 = vrot.slane %v4094_v51, 4  ;;  %v1761_v10 = vld [vmem:[%s4697_s6 + $0x48] sm:$0xff]  ;;  %v1782_v55 = vld [vmem:[%s4697_s6 + $0xf0] sm:$0xff] }
 0x37e   :  { %1502 = vrot.lane.b32.xlu1 %v1404_v44, %s2795_s25  ;;  %1532 = vrot.lane.b32.xlu0 %v1421_v52, %s2792_s1  ;;  %v1701_v29 = vsel %vm1057_vm11, %v1481_v26, 1.0  ;;  %v1412_v52 = vrot.slane %v4067_v33, 4  ;;  %v1775_v44 = vld [vmem:[%s4697_s6 + $0xb8] sm:$0xff]  ;;  %v1461_v46 = vrot.slane %v4094_v51, 5 }
 0x37f   :  { %v1745_v34 = vmul.f32 %v1721_v37, %v1701_v29  ;;  %v1479_v31 = vrot.slane %v4145_v11, 6  ;;  %2618 = vmatprep.subr.bf16.mxu0 %v2617_v28  ;;  %v1774_v37 = vld [vmem:[%s4697_s6 + $0xb0] sm:$0xff]  ;;  %v1451_v29 = vsel %vm122_vm3, %v1443_v2, %v1444_v6  ;;  %v1431_v12 = vrot.slane %v4145_v11, 7 }
 0x380   :  { %2620 = vmatpush3.bf16.msra.mxu0 %v2619_v59  ;;  %v1418_v26 = vsel %vm88_vm0, %v1412_v52, %v1413_v45  ;;  %v1419_v2 = vsel %vm88_vm0, %v1411_v19, %v1412_v52  ;;  %v1397_v6 = vrot.slane %v4094_v51, 3  ;;  %v1766_v52 = vld [vmem:[%s4697_s6 + $0x70] sm:$0xff] }
 0x381   :  { %2526 = vmatmul.mubr.msk.f32.gmra.mrb[20].mxu1 %vm1789_vm5, %v1745_v34  ;;  %v1480_v23 = vsel %vm156_vm7, %v1478_v9, %v1479_v31  ;;  %v1487_v35 = vsel %vm156_vm7, %v1479_v31, %v1472_v3  ;;  %vm4714_vm7 = vmmov %vm4712_vm9  ;;  %v1757_v9 = vld [vmem:[%s4697_s6 + $0x28] sm:$0xff]  ;;  %2622 = vmatprep.subr.bf16.mxu0 %v2621_v53  ;;  %v1758_v31 = vld [vmem:[%s4697_s6 + $0x30] sm:$0xff] }
 0x382   :  { %1630 = vrot.lane.b32.xlu1 %v1467_v40, %s2796_s29  ;;  %1500 = vrot.lane.b32.xlu0 %v1405_v24, %s2795_s25  ;;  %v1702_v36 = vsel %vm1057_vm11, %v1480_v23, 1.0  ;;  %v1703_v13 = vsel %vm1057_vm11, %v1487_v35, 1.0  ;;  %v1468_v21 = vsel %vm4714_vm7, %v1458_v17, %v1459_v4  ;;  %v1754_v17 = vld [vmem:[%s4697_s6 + $0x10] sm:$0xff]  ;;  %v1399_v4 = vrot.slane %v4145_v11, 3  ;;  %v1759_v24 = vld [vmem:[%s4697_s6 + $0x38] sm:$0xff]  ;;  %vm4715_vm14 = vmmov %vm4714_vm7 }
 0x383   :  { %v1748_v0 = vmul.f32 %v1724_v61, %v1702_v36  ;;  %v1751_v3 = vmul.f32 %v1727_v1, %v1703_v13  ;;  %v2623_v16 = vpack.c.bf16 %v1755_v5, %v1754_v17  ;;  %v2627_v34 = vpack.c.bf16 %v1757_v9, %v1756_v15  ;;  %v1776_v1 = vld [vmem:[%s4697_s6 + $0xc0] sm:$0xff]  ;;  %v1777_v40 = vld [vmem:[%s4697_s6 + $0xc8] sm:$0xff]  ;;  %vm4716_vm15 = vmmov %vm4714_vm7 }
 0x384   :  { %v2629_v61 = vpack.c.bf16 %v1775_v44, %v1774_v37  ;;  %v1407_v23 = vsel %vm71_vm1, %v1399_v4, %v1392_v48  ;;  %v1396_v35 = vrot.slane %v4067_v33, 3  ;;  %v1415_v36 = vrot.slane %v4145_v11, 4  ;;  %v1760_v13 = vld [vmem:[%s4697_s6 + $0x40] sm:$0xff]  ;;  %vm4717_vm8 = vmmov %vm4714_vm7 }
 0x385   :  { %2528 = vmatprep.mubr.msk.f32.mxu1 %vm1789_vm5, %v1748_v0  ;;  %2624 = vmatpush3.bf16.msra.mxu0 %v2623_v16  ;;  %v2631_v19 = vpack.c.bf16 %v1759_v24, %v1758_v31  ;;  %v2633_v48 = vpack.c.bf16 %v1777_v40, %v1776_v1  ;;  %v1779_v0 = vld [vmem:[%s4697_s6 + $0xd8] sm:$0xff]  ;;  %v1466_v17 = vsel %vm4715_vm14, %v1460_v22, %v1461_v46  ;;  %v1764_v53 = vld [vmem:[%s4697_s6 + $0x60] sm:$0xff]  ;;  %v1765_v22 = vld [vmem:[%s4697_s6 + $0x68] sm:$0xff]  ;;  %v1462_v15 = vrot.slane %v4124_v43, 5 }
 0x386   :  { %1568 = vrot.lane.b32.xlu1 %v1435_v25, %s2796_s29  ;;  %1628 = vrot.lane.b32.xlu0 %v1468_v21, %s2796_s29  ;;  %v1423_v30 = vsel %vm88_vm0, %v1415_v36, %v1408_v42  ;;  %v2635_v25 = vpack.c.bf16 %v1761_v10, %v1760_v13  ;;  %v1762_v21 = vld [vmem:[%s4697_s6 + $0x50] sm:$0xff]  ;;  %v2637_v28 = vpack.c.bf16 %v1779_v0, %v1778_v62  ;;  %v1446_v42 = vrot.slane %v4124_v43, 1 }
 0x387   :  { %2529 = vmatmul.mubr.msk.f32.gmra.mrb[22].mxu1 %vm1789_vm5, %v1751_v3  ;;  %2626 = vmatprep.subr.bf16.mxu0 %v2625_v27  ;;  %v1403_v3 = vsel %vm71_vm1, %v1395_v20, %v1396_v35  ;;  %v1763_v20 = vld [vmem:[%s4697_s6 + $0x58] sm:$0xff]  ;;  %v1439_v5 = vsel %vm105_vm2, %v1431_v12, %v1424_v57  ;;  %v1414_v57 = vrot.slane %v4124_v43, 4  ;;  %v1402_v16 = vsel %vm71_vm1, %v1396_v35, %v1397_v6 }
 0x388   :  { %v2639_v59 = vpack.c.bf16 %v1763_v20, %v1762_v21  ;;  %v2643_v9 = vpack.c.bf16 %v1765_v22, %v1764_v53  ;;  %v1767_v27 = vld [vmem:[%s4697_s6 + $0x78] sm:$0xff]  ;;  %v1465_v44 = vsel %vm4716_vm15, %v1461_v46, %v1462_v15  ;;  %v1398_v24 = vrot.slane %v4124_v43, 3 }
 0x389   :  { %2628 = vmatpush3.bf16.msra.mxu0 %v2627_v34  ;;  %v1417_v37 = vsel %vm88_vm0, %v1413_v45, %v1414_v57  ;;  %v2647_v34 = vpack.c.bf16 %v1767_v27, %v1766_v52  ;;  %v1463_v1 = vrot.slane %v4145_v11, 5 }
 0x38a   :  { %1600 = vrot.lane.b32.xlu1 %v1450_v49, %s2795_s25  ;;  %1566 = vrot.lane.b32.xlu0 %v1436_v38, %s2796_s29  ;;  %v1783_v49 = vld [vmem:[%s4697_s6 + $0xf8] sm:$0xff]  ;;  %v1449_v38 = vsel %vm122_vm3, %v1445_v39, %v1446_v42 }
 0x38b   :  { %2630 = vmatprep.subr.bf16.mxu0 %v2629_v61  ;;  %v2645_v39 = vpack.c.bf16 %v1783_v49, %v1782_v55  ;;  %v1447_v61 = vrot.slane %v4145_v11, 1  ;;  %v1464_v40 = vsel %vm4717_vm8, %v1462_v15, %v1463_v1  ;;  %v1383_v49 = vrot.slane %v4145_v11, 2 }
 0x38d   :  { %2632 = vmatpush3.bf16.msra.mxu0 %v2631_v19  ;;  %v1455_v35 = vsel %vm122_vm3, %v1447_v61, %v1440_v63  ;;  %v1400_v19 = vsel %vm71_vm1, %v1398_v24, %v1399_v4 }
 0x38e   :  { %1538 = vrot.lane.b32.xlu1 %v1418_v26, %s2792_s1  ;;  %1598 = vrot.lane.b32.xlu0 %v1451_v29, %s2795_s25  ;;  %v1429_v26 = vrot.slane %v4094_v51, 7  ;;  %v1430_v29 = vrot.slane %v4124_v43, 7 }
 0x38f   :  { %2634 = vmatprep.subr.bf16.mxu0 %v2633_v48 }
 0x390   :  { %v1434_v31 = vsel %vm105_vm2, %v1428_v14, %v1429_v26  ;;  %v1433_v45 = vsel %vm105_vm2, %v1429_v26, %v1430_v29  ;;  %v1448_v14 = vsel %vm122_vm3, %v1446_v42, %v1447_v61  ;;  %v1432_v13 = vsel %vm105_vm2, %v1430_v29, %v1431_v12 }
 0x391   :  { %2636 = vmatpush3.bf16.msra.mxu0 %v2635_v25  ;;  %vm2254_vm2 = vcmask 254976  }
 0x392   :  { %1536 = vrot.lane.b32.xlu0 %v1419_v2, %s2792_s1  ;;  %1496 = vrot.lane.b32.xlu1 %v1407_v23, %s2795_s25  ;;  %v1401_v2 = vsel %vm71_vm1, %v1397_v6, %v1398_v24  ;;  %v1416_v23 = vsel %vm88_vm0, %v1414_v57, %v1415_v36  ;;  %vm4718_vm0 = vmmov %vm4714_vm7  ;;  %v1708_v24 = vld [vmem:[%s4696_s5 + $0x20] sm:$0xff]  ;;  %vm2801_vm1 = vmmov 0  }
 0x393   :  { %2638 = vmatprep.subr.bf16.mxu0 %v2637_v28  ;;  %v1471_v36 = vsel %vm4718_vm0, %v1463_v1, %v1456_v41  ;;  %v1705_v41 = vld [vmem:[%s4696_s5 + $0x8] sm:$0xff]  ;;  %2566 = vmatprep.mubr.msk.f32.mxu1 %vm2801_vm1, %v2800_v56 }
 0x395   :  { %2640 = vmatpush3.bf16.msra.mxu0 %v2639_v59 }
 0x396   :  { %1504 = vrot.lane.b32.xlu0 %v1403_v3, %s2795_s25  ;;  %1528 = vrot.lane.b32.xlu1 %v1423_v30, %s2792_s1 }
 0x397   :  { %2642 = vmatprep.subr.bf16.mxu0 %v2641_v7 }
 0x399   :  { %2644 = vmatpush3.bf16.msra.mxu0 %v2643_v9  ;;  %v1378_v9 = vrot.slane %v4008_v32, 2 }
 0x39a   :  { %1632 = vrot.lane.b32.xlu0 %v1466_v17, %s2796_s29  ;;  %1560 = vrot.lane.b32.xlu1 %v1439_v5, %s2796_s29 }
 0x39b   :  { %2646 = vmatprep.subr.bf16.mxu0 %v2645_v39 }
 0x39d   :  { %2648 = vmatpush3.bf16.msra.mxu0 %v2647_v34 }
 0x39e   :  { %1602 = vrot.lane.b32.xlu0 %v1449_v38, %s2795_s25  ;;  %1506 = vrot.lane.b32.xlu1 %v1402_v16, %s2795_s25  ;;  %v1376_v38 = vrot.slane %v3988_v47, 2  ;;  %v1377_v16 = vrot.slane %v3995_v58, 2 }
 0x39f   :  { %2657 = vmatprep.subr.bf16.mxu0 %v2799_v50 }
 0x3a0   :  { %v1389_v29 = vsel %vm54_vm4, %v1377_v16, %v1378_v9 }
 0x3a2   :  { %1540 = vrot.lane.b32.xlu0 %v1417_v37, %s2792_s1  ;;  %1634 = vrot.lane.b32.xlu1 %v1465_v44, %s2796_s29  ;;  %v1391_v37 = vsel %vm54_vm4, %v1383_v49, %v1376_v38 }
 0x3a6   :  { %1570 = vrot.lane.b32.xlu0 %v1434_v31, %s2796_s29  ;;  %1572 = vrot.lane.b32.xlu1 %v1433_v45, %s2796_s29 }
 0x3aa   :  { %1508 = vrot.lane.b32.xlu0 %v1401_v2, %s2795_s25  ;;  %1604 = vrot.lane.b32.xlu1 %v1448_v14, %s2795_s25 }
 0x3ae   :  { %1636 = vrot.lane.b32.xlu0 %v1464_v40, %s2796_s29  ;;  %1542 = vrot.lane.b32.xlu1 %v1416_v23, %s2792_s1  ;;  %v1379_v23 = vrot.slane %v4049_v18, 2 }
 0x3b2   :  { %1606 = vrot.lane.b32.xlu0 %v1455_v35, %s2795_s25  ;;  %1510 = vrot.lane.b32.xlu1 %v1400_v19, %s2795_s25  ;;  %v1707_v19 = vld [vmem:[%s4696_s5 + $0x18] sm:$0xff] }
 0x3b6   :  { %1638 = vrot.lane.b32.xlu0 %v1471_v36, %s2796_s29  ;;  %1574 = vrot.lane.b32.xlu1 %v1432_v13, %s2796_s29  ;;  %s2802_s29 = smov [#allocation2]  }
 0x3b7   :  { %s2347_s17 = sshll.u32 %s2802_s29, 4  ;;  %s2348_s17 = int_to_ptr.vmem [resolvable:$true] %s2347_s17 }
 0x3b8   :  { %p2764_p1 = scmp.lt.s32.totalorder %s2348_s17, %s2348_s17 }
 0x3db   :  { %v1499_v63 = vpop.permute.xlu1 %1498 }
 0x3dc   :  { %v1593_v4 = vpop.permute.xlu0 %1592 }
 0x3dd   :  { %v1672_v46 = vsel %vm1057_vm11, %v3988_v47, %v1593_v4  ;;  %v1704_v47 = vld [vmem:[%s4696_s5] sm:$0xff] }
 0x3e0   :  { %v1627_v10 = vpop.permute.xlu1 %1626  ;;  %v1531_v48 = vpop.permute.xlu0 %1530 }
 0x3e1   :  { %v1680_v62 = vsel %vm1075_vm13, %v1672_v46, %v1531_v48  ;;  %v1380_v46 = vrot.slane %v4067_v33, 2 }
 0x3e4   :  { %v4433_v0 = vpop.permute.xlu1 %1564  ;;  %v1625_v3 = vpop.permute.xlu0 %1624 }
 0x3e5   :  { %v1688_v30 = vsel %vm1093_vm6, %v1680_v62, %v1625_v3 }
 0x3e6   :  { %v1729_v12 = vmul.f32 %v1705_v41, %v1688_v30 }
 0x3e8   :  { %v1597_v25 = vpop.permute.xlu1 %1596  ;;  %1881 = vmatprep.mubr.f32.mxu0 %v1729_v12  ;;  %v1563_v21 = vpop.permute.xlu0 %1562  ;;  %v1388_v12 = vsel %vm54_vm4, %v1378_v9, %v1379_v23 }
 0x3e9   :  { %v1674_v40 = vsel %vm1057_vm11, %v4008_v32, %v1597_v25 }
 0x3ec   :  { %v4436_v20 = vpop.permute.xlu1 %1534  ;;  %v1595_v28 = vpop.permute.xlu0 %1594 }
 0x3ed   :  { %v1673_v15 = vsel %vm1057_vm11, %v3995_v58, %v1595_v28  ;;  %v1390_v58 = vsel %vm54_vm4, %v1376_v38, %v1377_v16  ;;  %v1682_v13 = vsel %vm1075_vm13, %v1674_v40, %v4436_v20 }
 0x3ee   :  { %v1649_v61 = vsel %vm1057_vm11, %v1390_v58, %v1499_v63 }
 0x3ef   :  { %v1657_v1 = vsel %vm1075_vm13, %v1649_v61, %v1531_v48 }
 0x3f0   :  { %v1503_v42 = vpop.permute.xlu1 %1502  ;;  %v1533_v54 = vpop.permute.xlu0 %1532  ;;  %v1665_v36 = vsel %vm1093_vm6, %v1657_v1, %v1563_v21 }
 0x3f1   :  { %v1681_v39 = vsel %vm1075_vm13, %v1673_v15, %v1533_v54  ;;  %v1731_v30 = vmul.f32 %v1707_v19, %v1665_v36  ;;  %v1651_v25 = vsel %vm1057_vm11, %v1388_v12, %v1503_v42  ;;  %v1714_v42 = vld [vmem:[%s4696_s5 + $0x50] sm:$0xff]  ;;  %v1713_v15 = vld [vmem:[%s4696_s5 + $0x48] sm:$0xff] }
 0x3f2   :  { %v1689_v26 = vsel %vm1093_vm6, %v1681_v39, %v1627_v10  ;;  %v1711_v10 = vld [vmem:[%s4696_s5 + $0x38] sm:$0xff]  ;;  %v1659_v38 = vsel %vm1075_vm13, %v1651_v25, %v4436_v20  ;;  %v1717_v20 = vld [vmem:[%s4696_s5 + $0x68] sm:$0xff] }
 0x3f3   :  { %v1732_v63 = vmul.f32 %v1708_v24, %v1689_v26 }
 0x3f4   :  { %v1631_v60 = vpop.permute.xlu1 %1630  ;;  %v1501_v17 = vpop.permute.xlu0 %1500 }
 0x3f5   :  { %v1650_v2 = vsel %vm1057_vm11, %v1389_v29, %v1501_v17  ;;  %v1387_v17 = vsel %vm54_vm4, %v1379_v23, %v1380_v46 }
 0x3f6   :  { %v1658_v4 = vsel %vm1075_vm13, %v1650_v2, %v1533_v54 }
 0x3f7   :  { %v1666_v28 = vsel %vm1093_vm6, %v1658_v4, %v4433_v0 }
 0x3f8   :  { %v4438_v5 = vpop.permute.xlu1 %1568  ;;  %v1629_v6 = vpop.permute.xlu0 %1628 }
 0x3f9   :  { %v1690_v32 = vsel %vm1093_vm6, %v1682_v13, %v1629_v6 }
 0x3fa   :  { %v1735_v21 = vmul.f32 %v1711_v10, %v1690_v32 }
 0x3fc   :  { %v1601_v59 = vpop.permute.xlu1 %1600  ;;  %v4440_v53 = vpop.permute.xlu0 %1566 }
 0x3fd   :  { %v1676_v0 = vsel %vm1057_vm11, %v4067_v33, %v1601_v59  ;;  %v1667_v9 = vsel %vm1093_vm6, %v1659_v38, %v4440_v53  ;;  %v1382_v53 = vrot.slane %v4124_v43, 2 }
 0x3fe   :  { %v1737_v26 = vmul.f32 %v1713_v15, %v1667_v9 }
 0x400   :  { %v4442_v22 = vpop.permute.xlu1 %1538  ;;  %v1599_v7 = vpop.permute.xlu0 %1598 }
 0x401   :  { %v1675_v48 = vsel %vm1057_vm11, %v4049_v18, %v1599_v7  ;;  %v1710_v18 = vld [vmem:[%s4696_s5 + $0x30] sm:$0xff] }
 0x402   :  { %v1734_v16 = vmul.f32 %v1710_v18, %v1666_v28  ;;  %v1726_v28 = vld [vmem:[%s4696_s5 + $0xb0] sm:$0xff]  ;;  %v1725_v18 = vld [vmem:[%s4696_s5 + $0xa8] sm:$0xff] }
 0x404   :  { %v4444_v57 = vpop.permute.xlu0 %1536  ;;  %v1497_v55 = vpop.permute.xlu1 %1496 }
 0x405   :  { %v1648_v44 = vsel %vm1057_vm11, %v1391_v37, %v1497_v55  ;;  %v1683_v3 = vsel %vm1075_vm13, %v1675_v48, %v4444_v57 }
 0x406   :  { %v1691_v54 = vsel %vm1093_vm6, %v1683_v3, %v1631_v60  ;;  %v1381_v60 = vrot.slane %v4094_v51, 2 }
 0x407   :  { %v1738_v39 = vmul.f32 %v1714_v42, %v1691_v54 }
 0x408   :  { %v1505_v52 = vpop.permute.xlu0 %1504  ;;  %v4452_v27 = vpop.permute.xlu1 %1528  ;;  %v1385_v2 = vsel %vm54_vm4, %v1381_v60, %v1382_v53 }
 0x409   :  { %v1656_v34 = vsel %vm1075_vm13, %v1648_v44, %v4452_v27  ;;  %v1652_v55 = vsel %vm1057_vm11, %v1387_v17, %v1505_v52  ;;  %v1684_v52 = vsel %vm1075_vm13, %v1676_v0, %v4442_v22 }
 0x40a   :  { %v1660_v33 = vsel %vm1075_vm13, %v1652_v55, %v4444_v57  ;;  %v1386_v57 = vsel %vm54_vm4, %v1380_v46, %v1381_v60 }
 0x40c   :  { %v1633_v31 = vpop.permute.xlu0 %1632  ;;  %v1561_v45 = vpop.permute.xlu1 %1560 }
 0x40d   :  { %v1664_v14 = vsel %vm1093_vm6, %v1656_v34, %v1561_v45  ;;  %v1692_v59 = vsel %vm1093_vm6, %v1684_v52, %v1633_v31  ;;  %v1668_v31 = vsel %vm1093_vm6, %v1660_v33, %v4438_v5  ;;  %v1720_v45 = vld [vmem:[%s4696_s5 + $0x80] sm:$0xff]  ;;  %v2175_v33 = vld [vmem:[%s4699_s8 + $0x10] sm:$0xff] }
 0x40e   :  { %v1728_v35 = vmul.f32 %v1704_v47, %v1664_v14  ;;  %v1741_v29 = vmul.f32 %v1717_v20, %v1692_v59  ;;  %v2173_v52 = vld [vmem:[%s4699_s8] sm:$0xff]  ;;  %v2176_v59 = vld [vmem:[%s4699_s8 + $0x18] sm:$0xff] }
 0x410   :  { %v1603_v41 = vpop.permute.xlu0 %1602  ;;  %v1507_v62 = vpop.permute.xlu1 %1506  ;;  %1882 = vmatmul.mubr.f32.vlgmr.msra.gmra.mrb[8].mxu0 %v1728_v35  ;;  %v1719_v35 = vld [vmem:[%s4696_s5 + $0x78] sm:$0xff] }
 0x411   :  { %1886 = vmatprep.mubr.f32.mxu0 %v1732_v63  ;;  %v1677_v37 = vsel %vm1057_vm11, %v4094_v51, %v1603_v41  ;;  %v1653_v34 = vsel %vm1057_vm11, %v1386_v57, %v1507_v62  ;;  %v1716_v51 = vld [vmem:[%s4696_s5 + $0x60] sm:$0xff] }
 0x412   :  { %v1661_v5 = vsel %vm1075_vm13, %v1653_v34, %v4442_v22  ;;  %v1740_v40 = vmul.f32 %v1716_v51, %v1668_v31  ;;  %v1723_v22 = vld [vmem:[%s4696_s5 + $0x98] sm:$0xff] }
 0x414   :  { %v1541_v6 = vpop.permute.xlu0 %1540  ;;  %v1635_v7 = vpop.permute.xlu1 %1634  ;;  %1887 = vmatmul.mubr.f32.gmra.mrb[10].mxu0 %v1731_v30  ;;  %v1384_v30 = vsel %vm54_vm4, %v1382_v53, %v1383_v49 }
 0x415   :  { %1891 = vmatprep.mubr.f32.mxu0 %v1735_v21  ;;  %v1685_v58 = vsel %vm1075_vm13, %v1677_v37, %v1541_v6  ;;  %v2673_v37 = vpack.c.bf16 %v2176_v59, %v2175_v33 }
 0x416   :  { %v1693_v24 = vsel %vm1093_vm6, %v1685_v58, %v1635_v7  ;;  %v2179_v58 = vld [vmem:[%s4699_s8 + $0x30] sm:$0xff] }
 0x417   :  { %v1744_v23 = vmul.f32 %v1720_v45, %v1693_v24 }
 0x418   :  { %v1571_v44 = vpop.permute.xlu0 %1570  ;;  %v1573_v47 = vpop.permute.xlu1 %1572  ;;  %1892 = vmatmul.mubr.f32.gmra.mrb[12].mxu0 %v1734_v16 }
 0x419   :  { %1896 = vmatprep.mubr.f32.mxu0 %v1738_v39  ;;  %v1669_v19 = vsel %vm1093_vm6, %v1661_v5, %v1571_v44  ;;  %v2174_v39 = vld [vmem:[%s4699_s8 + $0x8] sm:$0xff]  ;;  %v2177_v44 = vld [vmem:[%s4699_s8 + $0x20] sm:$0xff] }
 0x41a   :  { %v1743_v32 = vmul.f32 %v1719_v35, %v1669_v19  ;;  %v2670_v20 = vpack.c.bf16 %v2174_v39, %v2173_v52 }
 0x41c   :  { %v1509_v61 = vpop.permute.xlu0 %1508  ;;  %v1605_v14 = vpop.permute.xlu1 %1604  ;;  %1897 = vmatmul.mubr.f32.gmra.mrb[14].mxu0 %v1737_v26  ;;  %2671 = vmatpush3.bf16.msra.mxu1 %v2670_v20  ;;  %v2180_v26 = vld [vmem:[%s4699_s8 + $0x38] sm:$0xff] }
 0x41d   :  { %v1654_v1 = vsel %vm1057_vm11, %v1385_v2, %v1509_v61  ;;  %1901 = vmatprep.mubr.f32.mxu0 %v1741_v29  ;;  %v1678_v13 = vsel %vm1057_vm11, %v4124_v43, %v1605_v14  ;;  %v1722_v43 = vld [vmem:[%s4696_s5 + $0x90] sm:$0xff]  ;;  %2672 = vmatprep.subr.bf16.mxu1 %v2799_v50  ;;  %v2679_v57 = vpack.c.bf16 %v2180_v26, %v2179_v58 }
 0x41e   :  { %v1662_v36 = vsel %vm1075_vm13, %v1654_v1, %v1541_v6 }
 0x41f   :  { %v1670_v41 = vsel %vm1093_vm6, %v1662_v36, %v1573_v47  ;;  %v2178_v47 = vld [vmem:[%s4699_s8 + $0x28] sm:$0xff] }
 0x420   :  { %v1637_v63 = vpop.permute.xlu0 %1636  ;;  %v1543_v4 = vpop.permute.xlu1 %1542  ;;  %1902 = vmatmul.mubr.f32.gmra.mrb[16].mxu0 %v1740_v40  ;;  %v1746_v21 = vmul.f32 %v1722_v43, %v1670_v41  ;;  %2674 = vmatpush3.bf16.msra.mxu1 %v2673_v37  ;;  %v2676_v53 = vpack.c.bf16 %v2178_v47, %v2177_v44 }
 0x421   :  { %v1686_v10 = vsel %vm1075_vm13, %v1678_v13, %v1543_v4  ;;  %1906 = vmatprep.mubr.f32.mxu0 %v1744_v23  ;;  %2675 = vmatprep.subr.bf16.mxu1 %v2799_v50 }
 0x422   :  { %v1694_v48 = vsel %vm1093_vm6, %v1686_v10, %v1637_v63 }
 0x423   :  { %v1747_v46 = vmul.f32 %v1723_v22, %v1694_v48 }
 0x424   :  { %v1607_v62 = vpop.permute.xlu0 %1606  ;;  %v1511_v3 = vpop.permute.xlu1 %1510  ;;  %1907 = vmatmul.mubr.f32.gmra.mrb[18].mxu0 %v1743_v32  ;;  %2677 = vmatpush3.bf16.msra.mxu1 %v2676_v53 }
 0x425   :  { %v1679_v12 = vsel %vm1057_vm11, %v4145_v11, %v1607_v62  ;;  %v1655_v25 = vsel %vm1057_vm11, %v1384_v30, %v1511_v3  ;;  %1911 = vmatprep.mubr.f32.mxu0 %v1747_v46  ;;  %2678 = vmatprep.subr.bf16.mxu1 %v2799_v50 }
 0x426   :  { %v1687_v8 = vsel %vm1075_vm13, %v1679_v12, %v4452_v27  ;;  %v1663_v17 = vsel %vm1075_vm13, %v1655_v25, %v1543_v4 }
 0x428   :  { %v1639_v54 = vpop.permute.xlu0 %1638  ;;  %v1575_v49 = vpop.permute.xlu1 %1574  ;;  %1912 = vmatmul.mubr.f32.gmra.mrb[20].mxu0 %v1746_v21  ;;  %2680 = vmatpush3.bf16.msra.mxu1 %v2679_v57 }
 0x429   :  { %v1695_v11 = vsel %vm1093_vm6, %v1687_v8, %v1639_v54  ;;  %v1671_v6 = vsel %vm1093_vm6, %v1663_v17, %v1575_v49 }
 0x42a   :  { %v1750_v7 = vmul.f32 %v1726_v28, %v1695_v11  ;;  %v1749_v42 = vmul.f32 %v1725_v18, %v1671_v6 }
 0x42c   :  { %1916 = vmatprep.mubr.f32.mxu0 %v1750_v7 }
 0x42d   :  { %1917 = vmatmul.mubr.f32.gmra.mrb[22].mxu0 %v1749_v42 }
 0x42e   :  { %2547 = vmatprep.mubr.msk.f32.mxu0 %vm2801_vm1, %v2800_v56 }
 0x443   :  { %v2521_v55 = vpop.f32.mrb[16].mxu1 }
 0x444   :  { %v1988_v0 = vpop.f32.mrb[17].mxu1 }
 0x44b   :  { %v2524_v38 = vpop.f32.mrb[18].mxu1 }
 0x44c   :  { %v1998_v60 = vpop.f32.mrb[19].mxu1 }
 0x454   :  { %v4584_v16 = vpop.f32.mrb[20].mxu1 }
 0x455   :  { %v2008_v15 = vpop.f32.mrb[21].mxu1 }
 0x45a   :  { %v4586_v27 = vpop.f32.mrb[22].mxu1 }
 0x45b   :  { %v4588_v9 = vpop.f32.mrb[23].mxu1 }
 0x4e3   :  { %v2429_v29 = vpop.f32.mrb[8].mxu0 }
 0x4e4   :  { %v2430_v34 = vpop.f32.mrb[9].mxu0 }
 0x4e5   :  { %v2431_v31 = vadd.f32 %v2430_v34, %v2429_v29 }
 0x4e7   :  { %v4621_v51 = vadd.f32 %v2431_v31, %v1988_v0  ;;  %v2432_v45 = vpop.f32.mrb[10].mxu0 }
 0x4e8   :  { %v2433_v24 = vpop.f32.mrb[11].mxu0 }
 0x4e9   :  { %v2035_v61 = vmul.f32 0.044715, %v4621_v51  ;;  %v2434_v2 = vadd.f32 %v2433_v24, %v2432_v45  ;;  %v2027_v45 = vmul.f32 0.5, %v4621_v51 }
 0x4eb   :  { %v2043_v14 = vmul.f32 %v2035_v61, %v4621_v51  ;;  %v1994_v1 = vadd.f32 %v2521_v55, %v2434_v2  ;;  %v2435_v5 = vpop.f32.mrb[12].mxu0 }
 0x4ec   :  { %v2436_v40 = vpop.f32.mrb[13].mxu0 }
 0x4ed   :  { %v2051_v23 = vmul.f32 %v2043_v14, %v4621_v51  ;;  %v2036_v35 = vmul.f32 0.044715, %v1994_v1  ;;  %v2437_v19 = vadd.f32 %v2436_v40, %v2435_v5  ;;  %v2028_v24 = vmul.f32 0.5, %v1994_v1 }
 0x4ef   :  { %v2059_v36 = vadd.f32 %v2051_v23, %v4621_v51  ;;  %v2044_v13 = vmul.f32 %v2036_v35, %v1994_v1  ;;  %v4627_v63 = vadd.f32 %v2437_v19, %v1998_v60  ;;  %v2438_v4 = vpop.f32.mrb[14].mxu0 }
 0x4f0   :  { %v2439_v22 = vpop.f32.mrb[15].mxu0 }
 0x4f1   :  { %v2052_v10 = vmul.f32 %v2044_v13, %v1994_v1  ;;  %v2037_v32 = vmul.f32 0.044715, %v4627_v63  ;;  %v2440_v48 = vadd.f32 %v2439_v22, %v2438_v4  ;;  %v2067_v46 = vmul.f32 0.7978846, %v2059_v36 }
 0x4f3   :  { %v2060_v41 = vadd.f32 %v2052_v10, %v1994_v1  ;;  %v2045_v43 = vmul.f32 %v2037_v32, %v4627_v63  ;;  %v4631_v62 = vadd.f32 %v2524_v38, %v2440_v48  ;;  %v2441_v3 = vpop.f32.mrb[16].mxu0  ;;  %2739 = vtanh.f32 %v2067_v46 }
 0x4f4   :  { %v2442_v30 = vpop.f32.mrb[17].mxu0  ;;  %v2029_v48 = vmul.f32 0.5, %v4627_v63 }
 0x4f5   :  { %v2053_v12 = vmul.f32 %v2045_v43, %v4627_v63  ;;  %v2038_v25 = vmul.f32 0.044715, %v4631_v62  ;;  %v2443_v21 = vadd.f32 %v2442_v30, %v2441_v3  ;;  %v2068_v28 = vmul.f32 0.7978846, %v2060_v41 }
 0x4f7   :  { %v2061_v18 = vadd.f32 %v2053_v12, %v4627_v63  ;;  %v2046_v54 = vmul.f32 %v2038_v25, %v4631_v62  ;;  %v4637_v8 = vadd.f32 %v2443_v21, %v2008_v15  ;;  %v2444_v49 = vpop.f32.mrb[18].mxu0  ;;  %2741 = vtanh.f32 %v2068_v28 }
 0x4f8   :  { %v2445_v17 = vpop.f32.mrb[19].mxu0 }
 0x4f9   :  { %v2054_v11 = vmul.f32 %v2046_v54, %v4631_v62  ;;  %v2039_v6 = vmul.f32 0.044715, %v4637_v8  ;;  %v2446_v7 = vadd.f32 %v2445_v17, %v2444_v49  ;;  %v2069_v42 = vmul.f32 0.7978846, %v2061_v18 }
 0x4fa   :  { %v2031_v18 = vmul.f32 0.5, %v4637_v8 }
 0x4fb   :  { %v2062_v55 = vadd.f32 %v2054_v11, %v4631_v62  ;;  %v2047_v0 = vmul.f32 %v2039_v6, %v4637_v8  ;;  %v2014_v38 = vadd.f32 %v4584_v16, %v2446_v7  ;;  %v2447_v60 = vpop.f32.mrb[20].mxu0  ;;  %2743 = vtanh.f32 %v2069_v42 }
 0x4fc   :  { %v2448_v52 = vpop.f32.mrb[21].mxu0 }
 0x4fd   :  { %v2740_v15 = vpop.eup %2739  ;;  %v2055_v39 = vmul.f32 %v2047_v0, %v4637_v8  ;;  %v2040_v33 = vmul.f32 0.044715, %v2014_v38  ;;  %v2449_v20 = vadd.f32 %v2448_v52, %v2447_v60  ;;  %v2070_v59 = vmul.f32 0.7978846, %v2062_v55 }
 0x4fe   :  { %v2083_v58 = vadd.f32 1.0, %v2740_v15  ;;  %v2032_v54 = vmul.f32 0.5, %v2014_v38 }
 0x4ff   :  { %v2063_v37 = vadd.f32 %v2055_v39, %v4637_v8  ;;  %v2048_v44 = vmul.f32 %v2040_v33, %v2014_v38  ;;  %v2019_v47 = vadd.f32 %v2449_v20, %v4588_v9  ;;  %2745 = vtanh.f32 %v2070_v59  ;;  %v2099_v8 = vld [vmem:[%s4698_s7] sm:$0x3] }
 0x500   :  { %v2450_v53 = vpop.f32.mrb[22].mxu0  ;;  %v2091_v40 = vmul.f32 %v2083_v58, %v2027_v45 }
 0x501   :  { %v2742_v26 = vpop.eup %2741  ;;  %v2056_v57 = vmul.f32 %v2048_v44, %v2014_v38  ;;  %v2041_v16 = vmul.f32 0.044715, %v2019_v47  ;;  %v2451_v29 = vpop.f32.mrb[23].mxu0  ;;  %v2071_v34 = vmul.f32 0.7978846, %v2063_v37  ;;  %v2033_v42 = vmul.f32 0.5, %v2019_v47 }
 0x502   :  { %v2452_v31 = vadd.f32 %v2451_v29, %v2450_v53  ;;  %v2084_v61 = vadd.f32 1.0, %v2742_v26  ;;  %v2261_v37 = vld [vmem:[%s4700_s9] sm:$0xff]  ;;  %v2262_v44 = vld [vmem:[%s4700_s9 + $0x8] sm:$0xff]  ;;  %v2264_v53 = vld [vmem:[%s4700_s9 + $0x18] sm:$0xff] }
 0x503   :  { %v2064_v2 = vadd.f32 %v2056_v57, %v2014_v38  ;;  %v2049_v14 = vmul.f32 %v2041_v16, %v2019_v47  ;;  %2747 = vtanh.f32 %v2071_v34 }
 0x504   :  { %v2024_v5 = vadd.f32 %v4586_v27, %v2452_v31  ;;  %v2092_v9 = vmul.f32 %v2084_v61, %v2028_v24  ;;  %v2030_v27 = vmul.f32 0.5, %v4631_v62 }
 0x505   :  { %v2744_v23 = vpop.eup %2743  ;;  %v2057_v35 = vmul.f32 %v2049_v14, %v2019_v47  ;;  %v2072_v19 = vmul.f32 0.7978846, %v2064_v2 }
 0x506   :  { %v2042_v36 = vmul.f32 0.044715, %v2024_v5  ;;  %v2658_v13 = vpack.c.bf16 %v2092_v9, %v2091_v40  ;;  %v2085_v10 = vadd.f32 1.0, %v2744_v23  ;;  %v2034_v55 = vmul.f32 0.5, %v2024_v5 }
 0x507   :  { %v2065_v4 = vadd.f32 %v2057_v35, %v2019_v47  ;;  %2749 = vtanh.f32 %v2072_v19  ;;  %v2682_v47 = vpack.c.bf16 %v2262_v44, %v2261_v37 }
 0x508   :  { %v2050_v22 = vmul.f32 %v2042_v36, %v2024_v5  ;;  %2659 = vmatpush3.bf16.msra.mxu0 %v2658_v13  ;;  %v2093_v43 = vmul.f32 %v2085_v10, %v2029_v48 }
 0x509   :  { %v2746_v51 = vpop.eup %2745  ;;  %2660 = vmatprep.subr.bf16.mxu0 %v2799_v50  ;;  %v2073_v1 = vmul.f32 0.7978846, %v2065_v4 }
 0x50a   :  { %v2058_v32 = vmul.f32 %v2050_v22, %v2024_v5  ;;  %v2086_v46 = vadd.f32 1.0, %v2746_v51 }
 0x50b   :  { %2751 = vtanh.f32 %v2073_v1 }
 0x50c   :  { %v2066_v41 = vadd.f32 %v2058_v32, %v2024_v5  ;;  %v2094_v3 = vmul.f32 %v2086_v46, %v2030_v27 }
 0x50d   :  { %v2748_v30 = vpop.eup %2747 }
 0x50e   :  { %v2661_v12 = vpack.c.bf16 %v2094_v3, %v2093_v43  ;;  %v2074_v25 = vmul.f32 0.7978846, %v2066_v41  ;;  %v2087_v21 = vadd.f32 1.0, %v2748_v30 }
 0x510   :  { %2662 = vmatpush3.bf16.msra.mxu0 %v2661_v12  ;;  %2753 = vtanh.f32 %v2074_v25  ;;  %v2095_v49 = vmul.f32 %v2087_v21, %v2031_v18 }
 0x511   :  { %v2750_v28 = vpop.eup %2749  ;;  %2663 = vmatprep.subr.bf16.mxu0 %v2799_v50 }
 0x512   :  { %v2088_v63 = vadd.f32 1.0, %v2750_v28 }
 0x514   :  { %v2096_v62 = vmul.f32 %v2088_v63, %v2032_v54 }
 0x515   :  { %v2752_v17 = vpop.eup %2751 }
 0x516   :  { %v2664_v11 = vpack.c.bf16 %v2096_v62, %v2095_v49  ;;  %v2089_v6 = vadd.f32 1.0, %v2752_v17 }
 0x518   :  { %2665 = vmatpush3.bf16.msra.mxu0 %v2664_v11  ;;  %v2097_v60 = vmul.f32 %v2089_v6, %v2033_v42 }
 0x519   :  { %2666 = vmatprep.subr.bf16.mxu0 %v2799_v50 }
 0x51a   :  { %v2754_v7 = vpop.eup %2753 }
 0x51b   :  { %v2090_v0 = vadd.f32 1.0, %v2754_v7 }
 0x51d   :  { %v2098_v52 = vmul.f32 %v2090_v0, %v2034_v55 }
 0x51f   :  { %v2667_v15 = vpack.c.bf16 %v2098_v52, %v2097_v60 }
 0x521   :  { %2668 = vmatpush3.bf16.msra.mxu0 %v2667_v15 }
 0x522   :  { %2681 = vmatprep.subr.bf16.mxu0 %v2799_v50 }
 0x524   :  { %2548 = vmatmul.mubr.msk.f32.vlgmr.msra.gmra.mrb[24].mxu0 %vm1075_vm13, %v2099_v8 }
 0x525   :  { %2577 = vmatprep.mubr.msk.f32.mxu0 %vm2801_vm1, %v2800_v56  ;;  %v2263_v56 = vld [vmem:[%s4700_s9 + $0x10] sm:$0xff]  ;;  %2683 = vmatpush3.bf16.msra.mxu0 %v2682_v47  ;;  %s2759_s9 = scalar_lea.vmem %s2348_s17, 32 }
 0x526   :  { %v2685_v58 = vpack.c.bf16 %v2264_v53, %v2263_v56  ;;  %2684 = vmatprep.subr.bf16.mxu0 %v2799_v50  ;;  %p2760_p0 = scmp.ne.s32.totalorder %s2348_s17, %s2759_s9  ;;  %p2765_p2 = scmp.lt.s32.totalorder %s2759_s9, %s2759_s9 }
 0x528   :  { %p2766_p3 = por %p2765_p2, %p2764_p1 }
 0x529   :  { %2686 = vmatpush3.bf16.msra.mxu0 %v2685_v58 }
 0x52a   :  { %p2767_p4 = pnand %p2766_p3, %p2760_p0 }
 0x5f7   :  { %v2169_v38 = vpop.f32.mrb[24].mxu0 }
 0x5f8   :  { %2567 = vmatmul.mubr.msk.f32.vlgmr.msra.gmra.mrb[24].mxu1 %vm1075_vm13, %v2169_v38  ;;  %v2549_v39 = vpop.f32.mrb[25].mxu0 }
 0x6cb   :  { %v2250_v33 = vpop.f32.mrb[24].mxu1 }
 0x6cc   :  { %v2255_v20 = vsel %vm2254_vm2, %v2250_v33, -inf  ;;  %v2568_v59 = vpop.f32.mrb[25].mxu1 }
 0x6cd   :  { %2256 = vmax.xlane.f32.xlu0 %v2255_v20 }
 0x75a   :  { %v2257_v26 = vpop.xlane.xlu0 %2256 }
 0x75b   :  { %v2258_v57 = vsub.f32 %v2250_v33, %v2257_v26 }
 0x75d   :  { %v2259_v16 = vmul.f32 1.442695, %v2258_v57 }
 0x75f   :  { %2755 = vpow2.f32 %v2259_v16 }
 0x769   :  { %v2756_v29 = vpop.eup %2755 }
 0x76a   :  { %2578 = vmatmul.mubr.msk.f32.vlgmr.msra.gmra.mrb[26].mxu0 %vm1057_vm11, %v2756_v29 }
 0x83d   :  { %v2334_v34 = vpop.f32.mrb[26].mxu0 }
 0x83e   :  { %2757 = vrcp.f32 %v2334_v34  ;;  %v2579_v31 = vpop.f32.mrb[27].mxu0 }
 0x848   :  { %v2758_v45 = vpop.eup %2757 }
 0x849   :  { %v2339_v24 = vmul.f32 %v2758_v45, %v2756_v29 }
 0x84b   :  { %2340 = vst.msk [vmem:[#allocation2] sm:$0x3] %vm2254_vm2, %v2339_v24 }
 0x84c   :  { %2770 = shalt.err (!%p2767_p4)
}
 0x84d   :  { %s2771_s3 = scalar_lea.hbm %s4701_s10, 32 }
 0x84e   :  { %p2772_p5 = scmp.ne.s32.totalorder %s4701_s10, %s2771_s3  ;;  %p2775_p6 = scmp.lt.u32.totalorder %s2771_s3, %s4701_s10 }
 0x850   :  { %p2777_p7 = pnand %p2775_p6, %p2772_p5 }
 0x852   :  { %2780 = shalt.err (!%p2777_p7)
}
 0x853   :  { %2350 = dma.vmem_to_hbm [thread:$0]  %s2348_s17, 32, %s4701_s10, [#allocation3]  }
 0x854   :  { %2781 = dma.done.wait [#allocation3], 32  }
 0x855   :  { %2782 = vsyncadd [#allocation3], 4294967264 }
 0x856   :  { %2354 = vsyncpa [#allocation3], 1 }

</bundles_post_ra>
